<compile_context>
chip_gen: v6e
topology: v6e:2x2x1
jax: 0.10.0
libtpu: 0.0.40
codegen_flags: <defaults>
</compile_context>

<pallas_src>
import functools

import numpy as np
import jax
import jax.numpy as jnp
from jax.experimental import pallas as pl
from jax.experimental.pallas import tpu as pltpu


# ----------------------------------------------------------------------------
# Host-side construction of the structured matrices (transposed layout).
# ----------------------------------------------------------------------------
def _upsample_matrix(n: int) -> np.ndarray:
    """(2n, n) interpolation matrix of nn.Upsample(scale_factor=2,
    mode='bilinear', align_corners=False)."""
    m = np.zeros((2 * n, n), dtype=np.float32)
    for i in range(2 * n):
        src = max((i + 0.5) * 0.5 - 0.5, 0.0)   # PyTorch clamps negative src to 0
        i0 = min(int(np.floor(src)), n - 1)
        i1 = min(i0 + 1, n - 1)
        lam = src - i0
        m[i, i0] += 1.0 - lam
        m[i, i1] += lam
    return m


def _rt_matrices(Uw: np.ndarray) -> np.ndarray:
    """(3, Wout, Win).  RT_dx[wo, w] = Uw[wo+dx-1, w]  (0 when wo+dx-1 is out of
    range -> conv zero padding in W).  Uw is the bilinear W-interpolation matrix
    (identity for stage 1)."""
    Wout, Win = Uw.shape
    mats = []
    for dx in range(3):
        R = np.zeros((Wout, Win), dtype=np.float32)
        lo = max(0, 1 - dx)
        hi = min(Wout, Wout + 1 - dx)
        R[lo:hi, :] = Uw[lo + dx - 1: hi + dx - 1, :]
        mats.append(R)
    return np.stack(mats)


def _rb_stack(Uw: np.ndarray, n_chunk: int) -> np.ndarray:
    """(3*nc*Wout, nc*Win): the three dx-tap W-interpolation/shift matrices,
    block-diagonal over the folded batch chunk, stacked along rows so the
    kernel applies all three taps with a single MXU matmul."""
    rt = _rt_matrices(Uw)
    eye = np.eye(n_chunk, dtype=np.float32)
    return np.concatenate([np.kron(eye, rt[dx]) for dx in range(3)], axis=0)


def _lt_matrices(K: np.ndarray, Uh: np.ndarray, scale: np.ndarray) -> np.ndarray:
    """(3, CI*Hin, CO*Hout).
    LT_dx[(ci,h), (co,ho)] = sum_dy scale[co]*K[co,ci,dy,dx]*Uh[ho+dy-1, h]
    (term dropped when ho+dy-1 is out of range -> conv zero padding in H).
    Uh is the bilinear H-interpolation matrix (identity for stage 1)."""
    CO, CI = K.shape[:2]
    Hout, Hin = Uh.shape
    mats = []
    for dx in range(3):
        M = np.zeros((CI * Hin, CO * Hout), dtype=np.float32)
        for dy in range(3):
            Ush = np.zeros((Hout, Hin), dtype=np.float32)
            lo = max(0, 1 - dy)
            hi = min(Hout, Hout + 1 - dy)
            Ush[lo:hi] = Uh[lo + dy - 1: hi + dy - 1]
            M += np.kron((K[:, :, dy, dx] * scale[:, None]).T, Ush.T)
        mats.append(M)
    return np.stack(mats)


def _pick_batch_chunk(n: int) -> int:
    """How many batch elements to fold into one grid step.
    Per-grid-step overhead (~0.35us) dwarfs this kernel's compute, so fold as
    much as possible; for N > 2 keep >= 2 grid steps so both v7x TensorCores
    get work under dimension_semantics=('parallel',)."""
    if n <= 2:
        return n
    target = (n + 1) // 2
    for c in range(min(target, n), 0, -1):
        if n % c == 0:
            return c
    return 1


# ----------------------------------------------------------------------------
# The fused kernel: 12 MXU matmuls + two bias/ReLU on VMEM-resident data.
# Activations are carried transposed & batch-folded as (nc*W, C*H):
#   row = (local batch)*W + w   (sublane axis),  col = c*H + h  (lane axis).
# ----------------------------------------------------------------------------
def _fused_kernel(x_ref, m_ref,
                  rb1_ref, lt1_ref, t1_ref,
                  rb2_ref, lt2_ref, t2_ref,
                  rb3_ref, lt3_ref,
                  o_ref):
    f32, bf16 = jnp.float32, jnp.bfloat16

    x = x_ref[...]                                   # f32 (nc*W, C*H)
    b = (x * m_ref[...] + x).astype(bf16)            # b_1 = x_1*map_1 + x_1

    def stage(act, rb_ref, lt_ref):
        rows_out = rb_ref.shape[0] // 3
        # One tall matmul applies the W-interp/shift of all three dx taps.
        s = jnp.dot(rb_ref[...], act, preferred_element_type=f32).astype(bf16)
        acc = None
        for dx in range(3):                           # static, sublane-aligned slices
            blk = s[dx * rows_out:(dx + 1) * rows_out, :]
            t = jnp.dot(blk, lt_ref[dx], preferred_element_type=f32)
            acc = t if acc is None else acc + t
        return acc

    # conv1 (+ folded BN scale) + lane-major shift + ReLU
    y = jnp.maximum(stage(b, rb1_ref, lt1_ref) + t1_ref[...], 0.0).astype(bf16)
    # upsample2x + conv2 (+ folded BN scale) + shift + ReLU
    y = jnp.maximum(stage(y, rb2_ref, lt2_ref) + t2_ref[...], 0.0).astype(bf16)
    # upsample2x + conv3 (no BN / ReLU) -> lane-dense (nc*4W, NO*4H) store
    o_ref[...] = stage(y, rb3_ref, lt3_ref).astype(o_ref.dtype)


def _forward_impl(x_1, map_1, rb1, lt1, t1, rb2, lt2, t2, rb3, lt3,
                  *, n_chunk, num_output):
    N, C, H, W = x_1.shape
    G = N // n_chunk
    CH = C * H
    rows_in = n_chunk * W
    rows_out = n_chunk * 4 * W
    RO = num_output * 4 * H                         # lane-dense output width

    # Layout plumbing (outside the kernel): (N,C,H,W) -> (N*W, C*H).
    xm = jnp.transpose(x_1, (0, 3, 1, 2)).reshape(N * W, CH)
    mm = jnp.transpose(map_1, (0, 3, 1, 2)).reshape(N * W, CH)

    consts = (rb1, lt1, t1, rb2, lt2, t2, rb3, lt3)

    batch_spec = pl.BlockSpec((rows_in, CH), lambda g: (g, 0))

    def const_spec(a):
        nd = a.ndim
        return pl.BlockSpec(a.shape, lambda g, _nd=nd: (0,) * _nd)

    out = pl.pallas_call(
        _fused_kernel,
        out_shape=jax.ShapeDtypeStruct((N * 4 * W, RO), jnp.float32),
        grid=(G,),
        in_specs=[batch_spec, batch_spec] + [const_spec(a) for a in consts],
        out_specs=pl.BlockSpec((rows_out, RO), lambda g: (g, 0)),
        compiler_params=pltpu.CompilerParams(
            dimension_semantics=("parallel",)),
    )(xm, mm, *consts)

    # (N*4W, NO*4H) -> (N, NO, 4H, 4W)
    out = out.reshape(N, 4 * W, num_output, 4 * H)
    return jnp.transpose(out, (0, 2, 3, 1))


_forward = jax.jit(_forward_impl, static_argnames=("n_chunk", "num_output"))


# ----------------------------------------------------------------------------
# Module wrapper with deterministic parameter init (BatchNorm folded, eval mode)
# ----------------------------------------------------------------------------
class BoundaryMapping2Pallas:
    def __init__(self, num_input, num_output, key):
        self.C = num_input
        self.num_output = num_output
        C, C2, C4 = num_input, num_input // 2, num_input // 4
        ks = jax.random.split(key, 11)
        # Conv weights, OIHW, bias=False on every conv used by forward().
        self.w1 = 0.1 * jax.random.normal(ks[0], (C2, C, 3, 3), jnp.float32)
        self.w2 = 0.1 * jax.random.normal(ks[1], (C4, C2, 3, 3), jnp.float32)
        self.w3 = 0.1 * jax.random.normal(ks[2], (num_output, C4, 3, 3), jnp.float32)

        def bn_fold(kg, kb, km, kv, c):
            eps = 1e-5
            gamma = 1.0 + 0.1 * jax.random.normal(kg, (c,), jnp.float32)
            beta = 0.1 * jax.random.normal(kb, (c,), jnp.float32)
            mean = 0.1 * jax.random.normal(km, (c,), jnp.float32)
            var = jax.random.uniform(kv, (c,), jnp.float32, minval=0.5, maxval=1.5)
            scale = gamma / jnp.sqrt(var + eps)
            shift = beta - mean * scale
            return scale, shift

        self.s1, self.t1 = bn_fold(ks[3], ks[4], ks[5], ks[6], C2)
        self.s2, self.t2 = bn_fold(ks[7], ks[8], ks[9], ks[10], C4)

        self._cache = {}     # (N, H, W) -> (n_chunk, device constants)

    def _constants(self, N, H, W):
        key = (N, H, W)
        cached = self._cache.get(key)
        if cached is not None:
            return cached

        n_chunk = _pick_batch_chunk(N)
        NO = self.num_output
        w1, w2, w3 = (np.asarray(a) for a in (self.w1, self.w2, self.w3))
        s1, s2 = np.asarray(self.s1), np.asarray(self.s2)
        t1, t2 = np.asarray(self.t1), np.asarray(self.t2)

        eyeH = np.eye(H, dtype=np.float32)
        eyeW = np.eye(W, dtype=np.float32)
        uh2, uw2 = _upsample_matrix(H), _upsample_matrix(W)          # (2H,H), (2W,W)
        uh3, uw3 = _upsample_matrix(2 * H), _upsample_matrix(2 * W)  # (4H,2H), (4W,2W)

        lt1 = _lt_matrices(w1, eyeH, s1)                              # (3, C*H,   C2*H)
        rb1 = _rb_stack(eyeW, n_chunk)                                # (3*nc*W,   nc*W)
        lt2 = _lt_matrices(w2, uh2, s2)                               # (3, C2*H,  C4*2H)
        rb2 = _rb_stack(uw2, n_chunk)                                 # (3*nc*2W,  nc*W)
        lt3 = _lt_matrices(w3, uh3, np.ones((NO,), np.float32))       # (3, C4*2H, NO*4H)
        rb3 = _rb_stack(uw3, n_chunk)                                 # (3*nc*4W,  nc*2W)

        # Lane-major biases: column index is co*Hout + ho -> bias[co].
        t1r = np.repeat(t1, H)[None, :].astype(np.float32)            # (1, C2*H)
        t2r = np.repeat(t2, 2 * H)[None, :].astype(np.float32)        # (1, C4*2H)

        bf = jnp.bfloat16
        consts = (jnp.asarray(rb1, bf), jnp.asarray(lt1, bf), jnp.asarray(t1r),
                  jnp.asarray(rb2, bf), jnp.asarray(lt2, bf), jnp.asarray(t2r),
                  jnp.asarray(rb3, bf), jnp.asarray(lt3, bf))
        cached = (n_chunk, consts)
        self._cache[key] = cached
        return cached

    def __call__(self, x_1, map_1):
        N, C, H, W = x_1.shape
        assert C == self.C
        n_chunk, consts = self._constants(N, H, W)
        return _forward(x_1, map_1, *consts,
                        n_chunk=n_chunk, num_output=self.num_output)


# ----------------------------------------------------------------------------
# Plain-JAX f32 reference (same semantics) used only as a correctness check.
# ----------------------------------------------------------------------------
def _reference_forward(model, x, mp):
    hp = jax.lax.Precision.HIGHEST

    def conv(z, w):
        return jax.lax.conv_general_dilated(
            z, w, (1, 1), ((1, 1), (1, 1)),
            dimension_numbers=('NCHW', 'OIHW', 'NCHW'), precision=hp)

    def up(z):
        UH = jnp.asarray(_upsample_matrix(z.shape[2]))
        UW = jnp.asarray(_upsample_matrix(z.shape[3]))
        z = jnp.einsum('ph,nchw->ncpw', UH, z, precision=hp)
        return jnp.einsum('qw,ncpw->ncpq', UW, z, precision=hp)

    def bnrelu(z, s, t):
        return jnp.maximum(z * s[None, :, None, None] + t[None, :, None, None], 0.0)

    b = x * mp + x
    y = bnrelu(conv(b, model.w1), model.s1, model.t1)
    y = up(y)
    y = bnrelu(conv(y, model.w2), model.s2, model.t2)
    y = up(y)
    return conv(y, model.w3)


if __name__ == "__main__":
    key = jax.random.PRNGKey(0)
    kx, km, kp = jax.random.split(key, 3)

    num_input, num_output = 8, 4
    N, H, W = 2, 16, 16

    x_1 = jax.random.normal(kx, (N, num_input, H, W), jnp.float32)
    map_1 = jax.random.uniform(km, (N, num_input, H, W), jnp.float32)

    model = BoundaryMapping2Pallas(num_input, num_output, kp)
    out = jax.block_until_ready(model(x_1, map_1))
    assert out.shape == (N, num_output, 4 * H, 4 * W), out.shape

    ref = _reference_forward(model, x_1, map_1)
    err = float(jnp.max(jnp.abs(out - ref)))
    scale = float(jnp.max(jnp.abs(ref)))
    # bf16 operands with f32 accumulation: error budget scales with output magnitude.
    assert err <= 5e-2 + 2e-2 * scale, f"max abs error {err} (ref max {scale})"

    # Second call exercises the steady-state path (cached constants + jit cache).
    out2 = jax.block_until_ready(model(x_1, map_1))
    assert out2.shape == out.shape

    print("KERNEL_OK")
</pallas_src>

<mosaic_0001>
module attributes {stable_mosaic.version = 11 : i64} {
  func.func @_fused_kernel(%arg0: i32, %arg1: memref<32x128xf32, #tpu.memory_space<vmem>>, %arg2: memref<32x128xf32, #tpu.memory_space<vmem>>, %arg3: memref<96x32xbf16, #tpu.memory_space<vmem>>, %arg4: memref<3x128x64xbf16, #tpu.memory_space<vmem>>, %arg5: memref<1x64xf32, #tpu.memory_space<vmem>>, %arg6: memref<192x32xbf16, #tpu.memory_space<vmem>>, %arg7: memref<3x64x64xbf16, #tpu.memory_space<vmem>>, %arg8: memref<1x64xf32, #tpu.memory_space<vmem>>, %arg9: memref<384x64xbf16, #tpu.memory_space<vmem>>, %arg10: memref<3x64x256xbf16, #tpu.memory_space<vmem>>, %arg11: memref<128x256xf32, #tpu.memory_space<vmem>>) attributes {dimension_semantics = [#tpu.dimension_semantics<parallel>], iteration_bounds = array<i64: 1>, scalar_prefetch = 0 : i64, scratch_operands = 0 : i64, tpu.core_type = #tpu.core_type<tc>, window_params = [{transform_indices = @transform_0, window_bounds = array<i64: 32, 128>}, {transform_indices = @transform_1, window_bounds = array<i64: 32, 128>}, {pipeline_mode = #tpu.pipeline_mode<synchronous>, transform_indices = @transform_2, window_bounds = array<i64: 96, 32>}, {pipeline_mode = #tpu.pipeline_mode<synchronous>, transform_indices = @transform_3, window_bounds = array<i64: 3, 128, 64>}, {pipeline_mode = #tpu.pipeline_mode<synchronous>, transform_indices = @transform_4, window_bounds = array<i64: 1, 64>}, {pipeline_mode = #tpu.pipeline_mode<synchronous>, transform_indices = @transform_5, window_bounds = array<i64: 192, 32>}, {pipeline_mode = #tpu.pipeline_mode<synchronous>, transform_indices = @transform_6, window_bounds = array<i64: 3, 64, 64>}, {pipeline_mode = #tpu.pipeline_mode<synchronous>, transform_indices = @transform_7, window_bounds = array<i64: 1, 64>}, {pipeline_mode = #tpu.pipeline_mode<synchronous>, transform_indices = @transform_8, window_bounds = array<i64: 384, 64>}, {pipeline_mode = #tpu.pipeline_mode<synchronous>, transform_indices = @transform_9, window_bounds = array<i64: 3, 64, 256>}, {transform_indices = @transform_10, window_bounds = array<i64: 128, 256>}]} {
    %c0 = arith.constant 0 : index
    %c0_0 = arith.constant 0 : index
    %0 = vector.load %arg1[%c0, %c0_0] : memref<32x128xf32, #tpu.memory_space<vmem>>, vector<32x128xf32>
    %c0_1 = arith.constant 0 : index
    %c0_2 = arith.constant 0 : index
    %1 = vector.load %arg2[%c0_1, %c0_2] : memref<32x128xf32, #tpu.memory_space<vmem>>, vector<32x128xf32>
    %2 = arith.mulf %0, %1 : vector<32x128xf32>
    %3 = arith.addf %2, %0 : vector<32x128xf32>
    %4 = arith.truncf %3 : vector<32x128xf32> to vector<32x128xbf16>
    %c0_3 = arith.constant 0 : index
    %c0_4 = arith.constant 0 : index
    %5 = vector.load %arg3[%c0_3, %c0_4] : memref<96x32xbf16, #tpu.memory_space<vmem>>, vector<96x32xbf16>
    %cst = arith.constant dense<0.000000e+00> : vector<96x128xf32>
    %6 = tpu.matmul %5, %4, %cst {dimension_numbers = #tpu.dot_dimension_numbers<[1], [0], [0], [1], [0, 0, 1, 1], [], []>} : vector<96x32xbf16>, vector<32x128xbf16>, vector<96x128xf32> -> vector<96x128xf32>
    %7 = arith.truncf %6 : vector<96x128xf32> to vector<96x128xbf16>
    %8 = vector.extract_strided_slice %7 {offsets = [0, 0], sizes = [32, 128], strides = [1, 1]} : vector<96x128xbf16> to vector<32x128xbf16>
    %c0_5 = arith.constant 0 : index
    %c0_6 = arith.constant 0 : index
    %c0_7 = arith.constant 0 : index
    %9 = vector.load %arg4[%c0_5, %c0_6, %c0_7] : memref<3x128x64xbf16, #tpu.memory_space<vmem>>, vector<1x128x64xbf16>
    %10 = vector.shape_cast %9 : vector<1x128x64xbf16> to vector<128x64xbf16>
    %cst_8 = arith.constant dense<0.000000e+00> : vector<32x64xf32>
    %11 = tpu.matmul %8, %10, %cst_8 {dimension_numbers = #tpu.dot_dimension_numbers<[1], [0], [0], [1], [0, 0, 1, 1], [], []>} : vector<32x128xbf16>, vector<128x64xbf16>, vector<32x64xf32> -> vector<32x64xf32>
    %12 = vector.extract_strided_slice %7 {offsets = [32, 0], sizes = [32, 128], strides = [1, 1]} : vector<96x128xbf16> to vector<32x128xbf16>
    %c1 = arith.constant 1 : index
    %c0_9 = arith.constant 0 : index
    %c0_10 = arith.constant 0 : index
    %13 = vector.load %arg4[%c1, %c0_9, %c0_10] : memref<3x128x64xbf16, #tpu.memory_space<vmem>>, vector<1x128x64xbf16>
    %14 = vector.shape_cast %13 : vector<1x128x64xbf16> to vector<128x64xbf16>
    %cst_11 = arith.constant dense<0.000000e+00> : vector<32x64xf32>
    %15 = tpu.matmul %12, %14, %cst_11 {dimension_numbers = #tpu.dot_dimension_numbers<[1], [0], [0], [1], [0, 0, 1, 1], [], []>} : vector<32x128xbf16>, vector<128x64xbf16>, vector<32x64xf32> -> vector<32x64xf32>
    %16 = arith.addf %11, %15 : vector<32x64xf32>
    %17 = vector.extract_strided_slice %7 {offsets = [64, 0], sizes = [32, 128], strides = [1, 1]} : vector<96x128xbf16> to vector<32x128xbf16>
    %c2 = arith.constant 2 : index
    %c0_12 = arith.constant 0 : index
    %c0_13 = arith.constant 0 : index
    %18 = vector.load %arg4[%c2, %c0_12, %c0_13] : memref<3x128x64xbf16, #tpu.memory_space<vmem>>, vector<1x128x64xbf16>
    %19 = vector.shape_cast %18 : vector<1x128x64xbf16> to vector<128x64xbf16>
    %cst_14 = arith.constant dense<0.000000e+00> : vector<32x64xf32>
    %20 = tpu.matmul %17, %19, %cst_14 {dimension_numbers = #tpu.dot_dimension_numbers<[1], [0], [0], [1], [0, 0, 1, 1], [], []>} : vector<32x128xbf16>, vector<128x64xbf16>, vector<32x64xf32> -> vector<32x64xf32>
    %21 = arith.addf %16, %20 : vector<32x64xf32>
    %c0_15 = arith.constant 0 : index
    %c0_16 = arith.constant 0 : index
    %22 = vector.load %arg5[%c0_15, %c0_16] : memref<1x64xf32, #tpu.memory_space<vmem>>, vector<1x64xf32>
    %23 = vector.broadcast %22 : vector<1x64xf32> to vector<32x64xf32>
    %24 = arith.addf %21, %23 : vector<32x64xf32>
    %cst_17 = arith.constant 0.000000e+00 : f32
    %25 = vector.broadcast %cst_17 : f32 to vector<32x64xf32>
    %26 = arith.maximumf %24, %25 : vector<32x64xf32>
    %27 = arith.truncf %26 : vector<32x64xf32> to vector<32x64xbf16>
    %c0_18 = arith.constant 0 : index
    %c0_19 = arith.constant 0 : index
    %28 = vector.load %arg6[%c0_18, %c0_19] : memref<192x32xbf16, #tpu.memory_space<vmem>>, vector<192x32xbf16>
    %cst_20 = arith.constant dense<0.000000e+00> : vector<192x64xf32>
    %29 = tpu.matmul %28, %27, %cst_20 {dimension_numbers = #tpu.dot_dimension_numbers<[1], [0], [0], [1], [0, 0, 1, 1], [], []>} : vector<192x32xbf16>, vector<32x64xbf16>, vector<192x64xf32> -> vector<192x64xf32>
    %30 = arith.truncf %29 : vector<192x64xf32> to vector<192x64xbf16>
    %31 = vector.extract_strided_slice %30 {offsets = [0, 0], sizes = [64, 64], strides = [1, 1]} : vector<192x64xbf16> to vector<64x64xbf16>
    %c0_21 = arith.constant 0 : index
    %c0_22 = arith.constant 0 : index
    %c0_23 = arith.constant 0 : index
    %32 = vector.load %arg7[%c0_21, %c0_22, %c0_23] : memref<3x64x64xbf16, #tpu.memory_space<vmem>>, vector<1x64x64xbf16>
    %33 = vector.shape_cast %32 : vector<1x64x64xbf16> to vector<64x64xbf16>
    %cst_24 = arith.constant dense<0.000000e+00> : vector<64x64xf32>
    %34 = tpu.matmul %31, %33, %cst_24 {dimension_numbers = #tpu.dot_dimension_numbers<[1], [0], [0], [1], [0, 0, 1, 1], [], []>} : vector<64x64xbf16>, vector<64x64xbf16>, vector<64x64xf32> -> vector<64x64xf32>
    %35 = vector.extract_strided_slice %30 {offsets = [64, 0], sizes = [64, 64], strides = [1, 1]} : vector<192x64xbf16> to vector<64x64xbf16>
    %c1_25 = arith.constant 1 : index
    %c0_26 = arith.constant 0 : index
    %c0_27 = arith.constant 0 : index
    %36 = vector.load %arg7[%c1_25, %c0_26, %c0_27] : memref<3x64x64xbf16, #tpu.memory_space<vmem>>, vector<1x64x64xbf16>
    %37 = vector.shape_cast %36 : vector<1x64x64xbf16> to vector<64x64xbf16>
    %cst_28 = arith.constant dense<0.000000e+00> : vector<64x64xf32>
    %38 = tpu.matmul %35, %37, %cst_28 {dimension_numbers = #tpu.dot_dimension_numbers<[1], [0], [0], [1], [0, 0, 1, 1], [], []>} : vector<64x64xbf16>, vector<64x64xbf16>, vector<64x64xf32> -> vector<64x64xf32>
    %39 = arith.addf %34, %38 : vector<64x64xf32>
    %40 = vector.extract_strided_slice %30 {offsets = [128, 0], sizes = [64, 64], strides = [1, 1]} : vector<192x64xbf16> to vector<64x64xbf16>
    %c2_29 = arith.constant 2 : index
    %c0_30 = arith.constant 0 : index
    %c0_31 = arith.constant 0 : index
    %41 = vector.load %arg7[%c2_29, %c0_30, %c0_31] : memref<3x64x64xbf16, #tpu.memory_space<vmem>>, vector<1x64x64xbf16>
    %42 = vector.shape_cast %41 : vector<1x64x64xbf16> to vector<64x64xbf16>
    %cst_32 = arith.constant dense<0.000000e+00> : vector<64x64xf32>
    %43 = tpu.matmul %40, %42, %cst_32 {dimension_numbers = #tpu.dot_dimension_numbers<[1], [0], [0], [1], [0, 0, 1, 1], [], []>} : vector<64x64xbf16>, vector<64x64xbf16>, vector<64x64xf32> -> vector<64x64xf32>
    %44 = arith.addf %39, %43 : vector<64x64xf32>
    %c0_33 = arith.constant 0 : index
    %c0_34 = arith.constant 0 : index
    %45 = vector.load %arg8[%c0_33, %c0_34] : memref<1x64xf32, #tpu.memory_space<vmem>>, vector<1x64xf32>
    %46 = vector.broadcast %45 : vector<1x64xf32> to vector<64x64xf32>
    %47 = arith.addf %44, %46 : vector<64x64xf32>
    %cst_35 = arith.constant 0.000000e+00 : f32
    %48 = vector.broadcast %cst_35 : f32 to vector<64x64xf32>
    %49 = arith.maximumf %47, %48 : vector<64x64xf32>
    %50 = arith.truncf %49 : vector<64x64xf32> to vector<64x64xbf16>
    %c0_36 = arith.constant 0 : index
    %c0_37 = arith.constant 0 : index
    %51 = vector.load %arg9[%c0_36, %c0_37] : memref<384x64xbf16, #tpu.memory_space<vmem>>, vector<384x64xbf16>
    %cst_38 = arith.constant dense<0.000000e+00> : vector<384x64xf32>
    %52 = tpu.matmul %51, %50, %cst_38 {dimension_numbers = #tpu.dot_dimension_numbers<[1], [0], [0], [1], [0, 0, 1, 1], [], []>} : vector<384x64xbf16>, vector<64x64xbf16>, vector<384x64xf32> -> vector<384x64xf32>
    %53 = arith.truncf %52 : vector<384x64xf32> to vector<384x64xbf16>
    %54 = vector.extract_strided_slice %53 {offsets = [0, 0], sizes = [128, 64], strides = [1, 1]} : vector<384x64xbf16> to vector<128x64xbf16>
    %c0_39 = arith.constant 0 : index
    %c0_40 = arith.constant 0 : index
    %c0_41 = arith.constant 0 : index
    %55 = vector.load %arg10[%c0_39, %c0_40, %c0_41] : memref<3x64x256xbf16, #tpu.memory_space<vmem>>, vector<1x64x256xbf16>
    %56 = vector.shape_cast %55 : vector<1x64x256xbf16> to vector<64x256xbf16>
    %cst_42 = arith.constant dense<0.000000e+00> : vector<128x256xf32>
    %57 = tpu.matmul %54, %56, %cst_42 {dimension_numbers = #tpu.dot_dimension_numbers<[1], [0], [0], [1], [0, 0, 1, 1], [], []>} : vector<128x64xbf16>, vector<64x256xbf16>, vector<128x256xf32> -> vector<128x256xf32>
    %58 = vector.extract_strided_slice %53 {offsets = [128, 0], sizes = [128, 64], strides = [1, 1]} : vector<384x64xbf16> to vector<128x64xbf16>
    %c1_43 = arith.constant 1 : index
    %c0_44 = arith.constant 0 : index
    %c0_45 = arith.constant 0 : index
    %59 = vector.load %arg10[%c1_43, %c0_44, %c0_45] : memref<3x64x256xbf16, #tpu.memory_space<vmem>>, vector<1x64x256xbf16>
    %60 = vector.shape_cast %59 : vector<1x64x256xbf16> to vector<64x256xbf16>
    %cst_46 = arith.constant dense<0.000000e+00> : vector<128x256xf32>
    %61 = tpu.matmul %58, %60, %cst_46 {dimension_numbers = #tpu.dot_dimension_numbers<[1], [0], [0], [1], [0, 0, 1, 1], [], []>} : vector<128x64xbf16>, vector<64x256xbf16>, vector<128x256xf32> -> vector<128x256xf32>
    %62 = arith.addf %57, %61 : vector<128x256xf32>
    %63 = vector.extract_strided_slice %53 {offsets = [256, 0], sizes = [128, 64], strides = [1, 1]} : vector<384x64xbf16> to vector<128x64xbf16>
    %c2_47 = arith.constant 2 : index
    %c0_48 = arith.constant 0 : index
    %c0_49 = arith.constant 0 : index
    %64 = vector.load %arg10[%c2_47, %c0_48, %c0_49] : memref<3x64x256xbf16, #tpu.memory_space<vmem>>, vector<1x64x256xbf16>
    %65 = vector.shape_cast %64 : vector<1x64x256xbf16> to vector<64x256xbf16>
    %cst_50 = arith.constant dense<0.000000e+00> : vector<128x256xf32>
    %66 = tpu.matmul %63, %65, %cst_50 {dimension_numbers = #tpu.dot_dimension_numbers<[1], [0], [0], [1], [0, 0, 1, 1], [], []>} : vector<128x64xbf16>, vector<64x256xbf16>, vector<128x256xf32> -> vector<128x256xf32>
    %67 = arith.addf %62, %66 : vector<128x256xf32>
    %c0_51 = arith.constant 0 : index
    %c0_52 = arith.constant 0 : index
    %68 = vector.load %arg11[%c0_51, %c0_52] : memref<128x256xf32, #tpu.memory_space<vmem>>, vector<128x256xf32>
    tpu.vector_store %arg11[%c0_51, %c0_52], %67 {strides = array<i32>} : memref<128x256xf32, #tpu.memory_space<vmem>>, vector<128x256xf32>,
    return
  }
  func.func @transform_0(%arg0: i32) -> (i32, i32) {
    %c0_i32 = arith.constant 0 : i32
    %c0_i32_0 = arith.constant 0 : i32
    return %arg0, %c0_i32 : i32, i32
  }
  func.func @transform_1(%arg0: i32) -> (i32, i32) {
    %c0_i32 = arith.constant 0 : i32
    %c0_i32_0 = arith.constant 0 : i32
    return %arg0, %c0_i32 : i32, i32
  }
  func.func @transform_2(%arg0: i32) -> (i32, i32) {
    %c0_i32 = arith.constant 0 : i32
    %c0_i32_0 = arith.constant 0 : i32
    %c0_i32_1 = arith.constant 0 : i32
    return %c0_i32, %c0_i32_0 : i32, i32
  }
  func.func @transform_3(%arg0: i32) -> (i32, i32, i32) {
    %c0_i32 = arith.constant 0 : i32
    %c0_i32_0 = arith.constant 0 : i32
    %c0_i32_1 = arith.constant 0 : i32
    %c0_i32_2 = arith.constant 0 : i32
    return %c0_i32, %c0_i32_0, %c0_i32_1 : i32, i32, i32
  }
  func.func @transform_4(%arg0: i32) -> (i32, i32) {
    %c0_i32 = arith.constant 0 : i32
    %c0_i32_0 = arith.constant 0 : i32
    %c0_i32_1 = arith.constant 0 : i32
    return %c0_i32, %c0_i32_0 : i32, i32
  }
  func.func @transform_5(%arg0: i32) -> (i32, i32) {
    %c0_i32 = arith.constant 0 : i32
    %c0_i32_0 = arith.constant 0 : i32
    %c0_i32_1 = arith.constant 0 : i32
    return %c0_i32, %c0_i32_0 : i32, i32
  }
  func.func @transform_6(%arg0: i32) -> (i32, i32, i32) {
    %c0_i32 = arith.constant 0 : i32
    %c0_i32_0 = arith.constant 0 : i32
    %c0_i32_1 = arith.constant 0 : i32
    %c0_i32_2 = arith.constant 0 : i32
    return %c0_i32, %c0_i32_0, %c0_i32_1 : i32, i32, i32
  }
  func.func @transform_7(%arg0: i32) -> (i32, i32) {
    %c0_i32 = arith.constant 0 : i32
    %c0_i32_0 = arith.constant 0 : i32
    %c0_i32_1 = arith.constant 0 : i32
    return %c0_i32, %c0_i32_0 : i32, i32
  }
  func.func @transform_8(%arg0: i32) -> (i32, i32) {
    %c0_i32 = arith.constant 0 : i32
    %c0_i32_0 = arith.constant 0 : i32
    %c0_i32_1 = arith.constant 0 : i32
    return %c0_i32, %c0_i32_0 : i32, i32
  }
  func.func @transform_9(%arg0: i32) -> (i32, i32, i32) {
    %c0_i32 = arith.constant 0 : i32
    %c0_i32_0 = arith.constant 0 : i32
    %c0_i32_1 = arith.constant 0 : i32
    %c0_i32_2 = arith.constant 0 : i32
    return %c0_i32, %c0_i32_0, %c0_i32_1 : i32, i32, i32
  }
  func.func @transform_10(%arg0: i32) -> (i32, i32) {
    %c0_i32 = arith.constant 0 : i32
    %c0_i32_0 = arith.constant 0 : i32
    return %arg0, %c0_i32 : i32, i32
  }
}

</mosaic_0001>

<bundles_post_ra>
// kernel: _forward_impl.1
= control target key start
LH: loop header
LB: loop body
LE: loop exit
PB: predicated region body
PF: predicated region fallthrough
CT: control target
= control target key end

     0   :  { %vm96_vm0 = vcmask 261120   ;;  %vm866_vm1 = vcmask 523264   ;;  %s3748_s0 = inlined_call_operand.vmem [shape: f32[32,128], index: 0, kind: input, shape index: {}]   ;;  %s3749_s1 = inlined_call_operand.vmem [shape: f32[32,128], index: 1, kind: input, shape index: {}]   ;;  %s3750_s2 = inlined_call_operand.vmem [shape: bf16[96,32], index: 2, kind: input, shape index: {}]   ;;  %s3751_s3 = inlined_call_operand.vmem [shape: bf16[3,128,64], index: 3, kind: input, shape index: {}]   ;;  %s3752_s5 = inlined_call_operand.vmem [shape: bf16[192,32], index: 5, kind: input, shape index: {}]   ;;  %s3753_s6 = inlined_call_operand.vmem [shape: bf16[3,64,64], index: 6, kind: input, shape index: {}]   ;;  %s3754_s4 = inlined_call_operand.vmem [shape: f32[1,64], index: 4, kind: input, shape index: {}]   ;;  %s3755_s8 = inlined_call_operand.vmem [shape: bf16[384,64], index: 8, kind: input, shape index: {}]   ;;  %s3756_s7 = inlined_call_operand.vmem [shape: f32[1,64], index: 7, kind: input, shape index: {}]   ;;  %s3757_s9 = inlined_call_operand.vmem [shape: bf16[3,64,256], index: 9, kind: input, shape index: {}]   ;;  %s3758_s10 = inlined_call_operand.vmem [shape: f32[128,256], index: 10, kind: output, shape index: {}]  }
   0x1   :  { %v38_v0 = vld [vmem:[%s3748_s0 + $0x10] sm:$0xff]  ;;  %v39_v1 = vld [vmem:[%s3748_s0 + $0x18] sm:$0xff]  ;;  %v36_v5 = vld [vmem:[%s3748_s0] sm:$0xff] }
   0x2   :  { %v42_v2 = vld [vmem:[%s3749_s1 + $0x10] sm:$0xff]  ;;  %v43_v3 = vld [vmem:[%s3749_s1 + $0x18] sm:$0xff]  ;;  %v37_v6 = vld [vmem:[%s3748_s0 + $0x8] sm:$0xff] }
   0x3   :  { %v46_v4 = vmul.f32 %v42_v2, %v38_v0  ;;  %v47_v7 = vmul.f32 %v43_v3, %v39_v1  ;;  %v40_v8 = vld [vmem:[%s3749_s1] sm:$0xff]  ;;  %v41_v9 = vld [vmem:[%s3749_s1 + $0x8] sm:$0xff]  ;;  %v2873_v20 = vld [vmem:[%s3751_s3 + $0x38] sm:$0xff]  }
   0x4   :  { %v44_v11 = vmul.f32 %v40_v8, %v36_v5  ;;  %v45_v12 = vmul.f32 %v41_v9, %v37_v6  ;;  %v2867_v13 = vld [vmem:[%s3750_s2] sm:$0xff]   ;;  %v2868_v19 = vld [vmem:[%s3750_s2 + $0x8] sm:$0xff]   ;;  %v2875_v21 = vld [vmem:[%s3751_s3 + $0x78] sm:$0xff]  }
   0x5   :  { %v50_v10 = vadd.f32 %v46_v4, %v38_v0  ;;  %v51_v14 = vadd.f32 %v47_v7, %v39_v1  ;;  %2658 = vmatprep.mubr.msk.bf16.mxu0 %vm96_vm0, %v2867_v13  ;;  %v2869_v22 = vld [vmem:[%s3750_s2 + $0x10] sm:$0xff]   ;;  %2670 = vmatprep.subr.bf16.mxu1 %v2875_v21  ;;  %v2879_v25 = vld [vmem:[%s3751_s3 + $0x68] sm:$0xff]   ;;  %v2870_v27 = vld [vmem:[%s3750_s2 + $0x18] sm:$0xff]  }
   0x6   :  { %v48_v15 = vadd.f32 %v44_v11, %v36_v5  ;;  %v49_v16 = vadd.f32 %v45_v12, %v37_v6  ;;  %v2877_v23 = vld [vmem:[%s3751_s3 + $0x70] sm:$0xff]   ;;  %2671 = vmatpush3.bf16.msra.mxu1 %v2875_v21  ;;  %v2876_v26 = vld [vmem:[%s3751_s3 + $0x28] sm:$0xff]   ;;  %v2881_v28 = vld [vmem:[%s3751_s3 + $0x60] sm:$0xff]  }
   0x7   :  { %v53_v17 = vpack.c.bf16 %v51_v14, %v50_v10  ;;  %v2874_v24 = vld [vmem:[%s3751_s3 + $0x30] sm:$0xff]   ;;  %2672 = vmatprep.subr.bf16.mxu1 %v2877_v23  ;;  %v2871_v29 = vld [vmem:[%s3750_s2 + $0x20] sm:$0xff]   ;;  %v2880_v31 = vld [vmem:[%s3751_s3 + $0x18] sm:$0xff]  }
   0x8   :  { %v52_v18 = vpack.c.bf16 %v49_v16, %v48_v15  ;;  %v2878_v30 = vld [vmem:[%s3751_s3 + $0x20] sm:$0xff]   ;;  %v2872_v32 = vld [vmem:[%s3750_s2 + $0x28] sm:$0xff]   ;;  %v2882_v33 = vld [vmem:[%s3751_s3 + $0x10] sm:$0xff]  }
   0x9   :  { %2654 = vmatprep.subr.bf16.mxu0 %v53_v17  ;;  %v2883_v34 = vld [vmem:[%s3751_s3 + $0x58] sm:$0xff]   ;;  %v2884_v35 = vld [vmem:[%s3751_s3 + $0x8] sm:$0xff]   ;;  %v2885_v36 = vld [vmem:[%s3751_s3 + $0x50] sm:$0xff]  }
   0xa   :  { %2655 = vmatpush3.bf16.msra.mxu0 %v53_v17  ;;  %2673 = vmatpush3.bf16.msra.mxu1 %v2877_v23  ;;  %v2886_v37 = vld [vmem:[%s3751_s3] sm:$0xff]   ;;  %v2887_v38 = vld [vmem:[%s3751_s3 + $0x48] sm:$0xff]   ;;  %v2889_v40 = vld [vmem:[%s3751_s3 + $0xb8] sm:$0xff]  }
   0xb   :  { %2656 = vmatprep.subr.bf16.mxu0 %v52_v18  ;;  %2674 = vmatprep.subr.bf16.mxu1 %v2879_v25  ;;  %v2888_v39 = vld [vmem:[%s3751_s3 + $0x40] sm:$0xff]   ;;  %v2890_v53 = vld [vmem:[%s3751_s3 + $0xb0] sm:$0xff]   ;;  %v2891_v56 = vld [vmem:[%s3751_s3 + $0xa8] sm:$0xff]  }
   0xc   :  { %v2892_v60 = vld [vmem:[%s3751_s3 + $0xa0] sm:$0xff]   ;;  %v2893_v61 = vld [vmem:[%s3751_s3 + $0x98] sm:$0xff]   ;;  %v2894_v62 = vld [vmem:[%s3751_s3 + $0x90] sm:$0xff]  }
   0xd   :  { %v2895_v63 = vld [vmem:[%s3751_s3 + $0x88] sm:$0xff]   ;;  %v2896_v0 = vld [vmem:[%s3751_s3 + $0x80] sm:$0xff]  }
   0xe   :  { %2657 = vmatpush3.bf16.msra.mxu0 %v52_v18  ;;  %2675 = vmatpush3.bf16.msra.mxu1 %v2879_v25  ;;  %v2897_v2 = vld [vmem:[%s3752_s5] sm:$0xff]  }
   0xf   :  { %2690 = vmatprep.subr.bf16.mxu0 %v2873_v20  ;;  %2676 = vmatprep.subr.bf16.mxu1 %v2881_v28  ;;  %v2905_v3 = vld [vmem:[%s3752_s5 + $0x40] sm:$0xff]  }
  0x10   :  { %v2372_v15 = vld [vmem:[%s3754_s4] ss:$0 sm:$0xff] }
  0x11   :  { %2659 = vmatmul.mubr.msk.bf16.vlgmr.msra.gmra.mxu0 %vm96_vm0, %v2868_v19 }
  0x12   :  { %2662 = vmatprep.mubr.msk.bf16.mxu0 %vm96_vm0, %v2869_v22  ;;  %2691 = vmatpush3.bf16.msra.mxu0 %v2873_v20 }
  0x13   :  { %2692 = vmatprep.subr.bf16.mxu0 %v2874_v24  ;;  %2677 = vmatpush3.bf16.msra.mxu1 %v2881_v28 }
  0x14   :  { %2678 = vmatprep.subr.bf16.mxu1 %v2883_v34 }
  0x16   :  { %2693 = vmatpush3.bf16.msra.mxu0 %v2874_v24 }
  0x17   :  { %2694 = vmatprep.subr.bf16.mxu0 %v2876_v26  ;;  %2679 = vmatpush3.bf16.msra.mxu1 %v2883_v34 }
  0x18   :  { %2680 = vmatprep.subr.bf16.mxu1 %v2885_v36 }
  0x19   :  { %2663 = vmatmul.mubr.msk.bf16.gmra.mxu0 %vm96_vm0, %v2870_v27 }
  0x1a   :  { %2666 = vmatprep.mubr.msk.bf16.mxu0 %vm96_vm0, %v2871_v29  ;;  %2695 = vmatpush3.bf16.msra.mxu0 %v2876_v26 }
  0x1b   :  { %2696 = vmatprep.subr.bf16.mxu0 %v2878_v30  ;;  %2681 = vmatpush3.bf16.msra.mxu1 %v2885_v36  ;;  %v2898_v36 = vld [vmem:[%s3752_s5 + $0x8] sm:$0xff]  }
  0x1c   :  { %2682 = vmatprep.subr.bf16.mxu1 %v2887_v38 }
  0x1e   :  { %2697 = vmatpush3.bf16.msra.mxu0 %v2878_v30 }
  0x1f   :  { %2698 = vmatprep.subr.bf16.mxu0 %v2880_v31  ;;  %2683 = vmatpush3.bf16.msra.mxu1 %v2887_v38  ;;  %v2899_v38 = vld [vmem:[%s3752_s5 + $0x10] sm:$0xff]  }
  0x20   :  { %2684 = vmatprep.subr.bf16.mxu1 %v2888_v39 }
  0x21   :  { %2667 = vmatmul.mubr.msk.bf16.gmra.mxu0 %vm96_vm0, %v2872_v32 }
  0x22   :  { %2699 = vmatpush3.bf16.msra.mxu0 %v2880_v31 }
  0x23   :  { %2700 = vmatprep.subr.bf16.mxu0 %v2882_v33  ;;  %2685 = vmatpush3.bf16.msra.mxu1 %v2888_v39  ;;  %v2907_v39 = vld [vmem:[%s3752_s5 + $0x50] sm:$0xff]  }
  0x24   :  { %2710 = vmatprep.subr.bf16.mxu1 %v2889_v40 }
  0x26   :  { %2701 = vmatpush3.bf16.msra.mxu0 %v2882_v33 }
  0x27   :  { %2702 = vmatprep.subr.bf16.mxu0 %v2884_v35 }
  0x2a   :  { %2703 = vmatpush3.bf16.msra.mxu0 %v2884_v35  ;;  %v2909_v35 = vld [vmem:[%s3753_s6 + $0x18] sm:$0xff]  }
  0x2b   :  { %2704 = vmatprep.subr.bf16.mxu0 %v2886_v37 }
  0x2e   :  { %2705 = vmatpush3.bf16.msra.mxu0 %v2886_v37  ;;  %v2906_v37 = vld [vmem:[%s3752_s5 + $0x48] sm:$0xff]  }
  0xd1   :  { %v2660_v41 = vpop.f32.mrf.mxu0 }
  0xd3   :  { %v149_v42 = vpop.f32.mrf.mxu0 }
  0xd5   :  { %v2661_v43 = vpop.f32.mrf.mxu0 }
  0xd6   :  { %v197_v46 = vpack.c.bf16 %v2661_v43, %v2660_v41  ;;  %v2900_v41 = vld [vmem:[%s3752_s5 + $0x18] sm:$0xff]   ;;  %v2901_v43 = vld [vmem:[%s3752_s5 + $0x20] sm:$0xff]  }
  0xd7   :  { %v152_v44 = vpop.f32.mrf.mxu0 }
  0xd8   :  { %v196_v45 = vpack.c.bf16 %v152_v44, %v149_v42  ;;  %v2908_v42 = vld [vmem:[%s3752_s5 + $0x58] sm:$0xff]   ;;  %v2902_v44 = vld [vmem:[%s3752_s5 + $0x28] sm:$0xff]  }
  0xd9   :  { %v2664_v47 = vpop.f32.mrf.mxu0 }
  0xda   :  { %2706 = vmatprep.mubr.bf16.mxu0 %v196_v45  ;;  %v2903_v45 = vld [vmem:[%s3752_s5 + $0x30] sm:$0xff]  }
  0xdb   :  { %v165_v48 = vpop.f32.mrf.mxu0  ;;  %2707 = vmatmul.mubr.bf16.vlgmr.msra.gmra.mxu0 %v197_v46  ;;  %v2904_v46 = vld [vmem:[%s3752_s5 + $0x38] sm:$0xff]  }
  0xdc   :  { %2734 = vmatprep.mubr.msk.bf16.mxu0 %vm96_vm0, %v2897_v2 }
  0xdd   :  { %v2665_v49 = vpop.f32.mrf.mxu0 }
  0xde   :  { %v199_v52 = vpack.c.bf16 %v2665_v49, %v2664_v47  ;;  %v2911_v47 = vld [vmem:[%s3753_s6 + $0x8] sm:$0xff]   ;;  %v2913_v49 = vld [vmem:[%s3753_s6 + $0x38] sm:$0xff]  }
  0xdf   :  { %v168_v50 = vpop.f32.mrf.mxu0 }
  0xe0   :  { %v198_v51 = vpack.c.bf16 %v168_v50, %v165_v48  ;;  %v2912_v48 = vld [vmem:[%s3753_s6] sm:$0xff]   ;;  %v2914_v50 = vld [vmem:[%s3753_s6 + $0x30] sm:$0xff]  }
  0xe1   :  { %v2668_v54 = vpop.f32.mrf.mxu0 }
  0xe2   :  { %2686 = vmatprep.mubr.bf16.mxu1 %v198_v51  ;;  %v2915_v51 = vld [vmem:[%s3753_s6 + $0x28] sm:$0xff]  }
  0xe3   :  { %2687 = vmatmul.mubr.bf16.vlgmr.msra.gmra.mxu1 %v199_v52  ;;  %v181_v55 = vpop.f32.mrf.mxu0  ;;  %v2916_v52 = vld [vmem:[%s3753_s6 + $0x20] sm:$0xff]  }
  0xe4   :  { %2711 = vmatpush3.bf16.msra.mxu1 %v2889_v40  ;;  %v2910_v40 = vld [vmem:[%s3753_s6 + $0x10] sm:$0xff]  }
  0xe5   :  { %2712 = vmatprep.subr.bf16.mxu1 %v2890_v53  ;;  %v2669_v57 = vpop.f32.mrf.mxu0 }
  0xe6   :  { %v201_v1 = vpack.c.bf16 %v2669_v57, %v2668_v54 }
  0xe7   :  { %v184_v58 = vpop.f32.mrf.mxu0 }
  0xe8   :  { %2713 = vmatpush3.bf16.msra.mxu1 %v2890_v53  ;;  %v200_v59 = vpack.c.bf16 %v184_v58, %v181_v55  ;;  %v2917_v53 = vld [vmem:[%s3753_s6 + $0x58] sm:$0xff]  }
  0xe9   :  { %2714 = vmatprep.subr.bf16.mxu1 %v2891_v56 }
  0xea   :  { %2726 = vmatprep.mubr.bf16.mxu1 %v200_v59 }
  0xec   :  { %2715 = vmatpush3.bf16.msra.mxu1 %v2891_v56 }
  0xed   :  { %2716 = vmatprep.subr.bf16.mxu1 %v2892_v60 }
  0xf0   :  { %2717 = vmatpush3.bf16.msra.mxu1 %v2892_v60 }
  0xf1   :  { %2718 = vmatprep.subr.bf16.mxu1 %v2893_v61 }
  0xf4   :  { %2719 = vmatpush3.bf16.msra.mxu1 %v2893_v61 }
  0xf5   :  { %2720 = vmatprep.subr.bf16.mxu1 %v2894_v62 }
  0xf8   :  { %2721 = vmatpush3.bf16.msra.mxu1 %v2894_v62 }
  0xf9   :  { %2722 = vmatprep.subr.bf16.mxu1 %v2895_v63 }
  0xfc   :  { %2723 = vmatpush3.bf16.msra.mxu1 %v2895_v63 }
  0xfd   :  { %2724 = vmatprep.subr.bf16.mxu1 %v2896_v0 }
 0x100   :  { %2725 = vmatpush3.bf16.msra.mxu1 %v2896_v0 }
 0x103   :  { %2727 = vmatmul.mubr.bf16.vlgmr.msra.gmra.mxu1 %v201_v1 }
 0x104   :  { %2750 = vmatprep.mubr.msk.bf16.mxu1 %vm96_vm0, %v2905_v3 }
 0x19b   :  { %v2708_v6 = vpop.f32.mrf.mxu0 }
 0x19d   :  { %v414_v8 = vpop.f32.mrf.mxu0 }
 0x19f   :  { %v2709_v11 = vpop.f32.mrf.mxu0 }
 0x1a1   :  { %v417_v19 = vpop.f32.mrf.mxu0 }
 0x1a3   :  { %v2688_v4 = vpop.f32.mrf.mxu1 }
 0x1a4   :  { %v423_v10 = vadd.f32 %v2708_v6, %v2688_v4 }
 0x1a5   :  { %v317_v5 = vpop.f32.mrf.mxu1 }
 0x1a6   :  { %v415_v13 = vadd.f32 %v414_v8, %v317_v5 }
 0x1a7   :  { %v2689_v7 = vpop.f32.mrf.mxu1 }
 0x1a8   :  { %v426_v17 = vadd.f32 %v2709_v11, %v2689_v7 }
 0x1a9   :  { %v320_v9 = vpop.f32.mrf.mxu1 }
 0x1aa   :  { %v418_v21 = vadd.f32 %v417_v19, %v320_v9 }
 0x1c3   :  { %v2728_v12 = vpop.f32.mrf.mxu1 }
 0x1c4   :  { %v545_v14 = vadd.f32 %v2728_v12, %v423_v10 }
 0x1c5   :  { %v528_v16 = vpop.f32.mrf.mxu1 }
 0x1c6   :  { %v543_v18 = vadd.f32 %v528_v16, %v415_v13  ;;  %v556_v22 = vadd.f32 %v2372_v15, %v545_v14  ;;  %v2918_v13 = vld [vmem:[%s3753_s6 + $0x50] sm:$0xff]  }
 0x1c7   :  { %v2729_v20 = vpop.f32.mrf.mxu1 }
 0x1c8   :  { %v546_v23 = vadd.f32 %v2729_v20, %v426_v17  ;;  %v554_v25 = vadd.f32 %v2372_v15, %v543_v18  ;;  %v560_v28 = vmax.f32 %v556_v22, 0.0  ;;  %v2919_v17 = vld [vmem:[%s3753_s6 + $0x48] sm:$0xff]  }
 0x1c9   :  { %v531_v24 = vpop.f32.mrf.mxu1 }
 0x1ca   :  { %v557_v26 = vadd.f32 %v2372_v15, %v546_v23  ;;  %v544_v27 = vadd.f32 %v531_v24, %v418_v21  ;;  %v558_v31 = vmax.f32 %v554_v25, 0.0  ;;  %v2920_v24 = vld [vmem:[%s3753_s6 + $0x40] sm:$0xff]  }
 0x1cc   :  { %v561_v29 = vmax.f32 %v557_v26, 0.0  ;;  %v555_v30 = vadd.f32 %v2372_v15, %v544_v27 }
 0x1ce   :  { %v563_v32 = vpack.c.bf16 %v561_v29, %v560_v28  ;;  %v559_v33 = vmax.f32 %v555_v30, 0.0  ;;  %v2921_v29 = vld [vmem:[%s3755_s8] sm:$0xff]  }
 0x1d0   :  { %v562_v34 = vpack.c.bf16 %v559_v33, %v558_v31  ;;  %2730 = vmatprep.subr.bf16.mxu0 %v563_v32  ;;  %2862 = vmatprep.subr.bf16.mxu1 %v563_v32 }
 0x1d1   :  { %2731 = vmatpush3.bf16.msra.mxu0 %v563_v32  ;;  %2864 = vmatpush3.bf16.msra.mxu1 %v563_v32 }
 0x1d2   :  { %2732 = vmatprep.subr.bf16.mxu0 %v562_v34  ;;  %2863 = vmatprep.subr.bf16.mxu1 %v562_v34 }
 0x1d5   :  { %2733 = vmatpush3.bf16.msra.mxu0 %v562_v34  ;;  %2865 = vmatpush3.bf16.msra.mxu1 %v562_v34 }
 0x1d6   :  { %2774 = vmatprep.subr.bf16.mxu0 %v2909_v35  ;;  %2758 = vmatprep.subr.bf16.mxu1 %v2913_v49 }
 0x1d8   :  { %2735 = vmatmul.mubr.msk.bf16.vlgmr.msra.gmra.mxu0 %vm96_vm0, %v2898_v36  ;;  %2751 = vmatmul.mubr.msk.bf16.vlgmr.msra.gmra.mxu1 %vm96_vm0, %v2906_v37 }
 0x1d9   :  { %2738 = vmatprep.mubr.msk.bf16.mxu0 %vm96_vm0, %v2899_v38  ;;  %2754 = vmatprep.mubr.msk.bf16.mxu1 %vm96_vm0, %v2907_v39 }
 0x1da   :  { %2775 = vmatpush3.bf16.msra.mxu0 %v2909_v35  ;;  %2759 = vmatpush3.bf16.msra.mxu1 %v2913_v49 }
 0x1db   :  { %2776 = vmatprep.subr.bf16.mxu0 %v2910_v40  ;;  %2760 = vmatprep.subr.bf16.mxu1 %v2914_v50 }
 0x1de   :  { %2777 = vmatpush3.bf16.msra.mxu0 %v2910_v40  ;;  %2761 = vmatpush3.bf16.msra.mxu1 %v2914_v50 }
 0x1df   :  { %2778 = vmatprep.subr.bf16.mxu0 %v2911_v47  ;;  %2762 = vmatprep.subr.bf16.mxu1 %v2915_v51 }
 0x1e0   :  { %2739 = vmatmul.mubr.msk.bf16.gmra.mxu0 %vm96_vm0, %v2900_v41  ;;  %2755 = vmatmul.mubr.msk.bf16.gmra.mxu1 %vm96_vm0, %v2908_v42 }
 0x1e1   :  { %2742 = vmatprep.mubr.msk.bf16.mxu0 %vm96_vm0, %v2901_v43 }
 0x1e2   :  { %2779 = vmatpush3.bf16.msra.mxu0 %v2911_v47  ;;  %2763 = vmatpush3.bf16.msra.mxu1 %v2915_v51 }
 0x1e3   :  { %2780 = vmatprep.subr.bf16.mxu0 %v2912_v48  ;;  %2764 = vmatprep.subr.bf16.mxu1 %v2916_v52 }
 0x1e6   :  { %2781 = vmatpush3.bf16.msra.mxu0 %v2912_v48  ;;  %2765 = vmatpush3.bf16.msra.mxu1 %v2916_v52 }
 0x1e7   :  { %2790 = vmatprep.subr.bf16.mxu1 %v2917_v53 }
 0x1e8   :  { %2743 = vmatmul.mubr.msk.bf16.gmra.mxu0 %vm96_vm0, %v2902_v44 }
 0x1e9   :  { %2746 = vmatprep.mubr.msk.bf16.mxu0 %vm96_vm0, %v2903_v45 }
 0x1f0   :  { %2747 = vmatmul.mubr.msk.bf16.gmra.mxu0 %vm96_vm0, %v2904_v46 }
 0x298   :  { %v2736_v54 = vpop.f32.mrf.mxu0  ;;  %v2752_v61 = vpop.f32.mrf.mxu1 }
 0x29a   :  { %v718_v55 = vpop.f32.mrf.mxu0  ;;  %v782_v0 = vpop.f32.mrf.mxu1 }
 0x29c   :  { %v2737_v56 = vpop.f32.mrf.mxu0  ;;  %v2753_v5 = vpop.f32.mrf.mxu1 }
 0x29d   :  { %v814_v59 = vpack.c.bf16 %v2737_v56, %v2736_v54  ;;  %v822_v27 = vpack.c.bf16 %v2753_v5, %v2752_v61 }
 0x29e   :  { %v721_v57 = vpop.f32.mrf.mxu0  ;;  %v785_v8 = vpop.f32.mrf.mxu1 }
 0x29f   :  { %v813_v58 = vpack.c.bf16 %v721_v57, %v718_v55  ;;  %v821_v21 = vpack.c.bf16 %v785_v8, %v782_v0 }
 0x2a0   :  { %v2740_v60 = vpop.f32.mrf.mxu0  ;;  %v2756_v14 = vpop.f32.mrf.mxu1 }
 0x2a1   :  { %2782 = vmatprep.mubr.msk.bf16.mxu0 %vm866_vm1, %v813_v58 }
 0x2a2   :  { %v734_v62 = vpop.f32.mrf.mxu0  ;;  %2783 = vmatmul.mubr.msk.bf16.vlgmr.msra.gmra.mxu0 %vm866_vm1, %v814_v59  ;;  %v798_v18 = vpop.f32.mrf.mxu1  ;;  %v2437_v59 = vld [vmem:[%s3756_s7] ss:$0 sm:$0xff] }
 0x2a4   :  { %v2741_v63 = vpop.f32.mrf.mxu0  ;;  %v2757_v23 = vpop.f32.mrf.mxu1 }
 0x2a5   :  { %v816_v3 = vpack.c.bf16 %v2741_v63, %v2740_v60  ;;  %v824_v28 = vpack.c.bf16 %v2757_v23, %v2756_v14 }
 0x2a6   :  { %v737_v1 = vpop.f32.mrf.mxu0  ;;  %v801_v25 = vpop.f32.mrf.mxu1 }
 0x2a7   :  { %v815_v2 = vpack.c.bf16 %v737_v1, %v734_v62  ;;  %v823_v26 = vpack.c.bf16 %v801_v25, %v798_v18 }
 0x2a8   :  { %v2744_v4 = vpop.f32.mrf.mxu0 }
 0x2a9   :  { %2786 = vmatprep.mubr.msk.bf16.mxu0 %vm866_vm1, %v815_v2 }
 0x2aa   :  { %v750_v6 = vpop.f32.mrf.mxu0  ;;  %2787 = vmatmul.mubr.msk.bf16.gmra.mxu0 %vm866_vm1, %v816_v3 }
 0x2ab   :  { %2814 = vmatprep.mubr.msk.bf16.mxu0 %vm866_vm1, %v2921_v29  ;;  %v2924_v29 = vld [vmem:[%s3755_s8 + $0x18] sm:$0xff]  }
 0x2ac   :  { %v2745_v7 = vpop.f32.mrf.mxu0 }
 0x2ad   :  { %v818_v11 = vpack.c.bf16 %v2745_v7, %v2744_v4 }
 0x2ae   :  { %v753_v9 = vpop.f32.mrf.mxu0 }
 0x2af   :  { %v817_v10 = vpack.c.bf16 %v753_v9, %v750_v6 }
 0x2b0   :  { %v2748_v12 = vpop.f32.mrf.mxu0 }
 0x2b1   :  { %2766 = vmatprep.mubr.msk.bf16.mxu1 %vm866_vm1, %v817_v10 }
 0x2b2   :  { %v766_v15 = vpop.f32.mrf.mxu0  ;;  %2767 = vmatmul.mubr.msk.bf16.vlgmr.msra.gmra.mxu1 %vm866_vm1, %v818_v11 }
 0x2b3   :  { %2791 = vmatpush3.bf16.msra.mxu1 %v2917_v53 }
 0x2b4   :  { %v2749_v16 = vpop.f32.mrf.mxu0  ;;  %2792 = vmatprep.subr.bf16.mxu1 %v2918_v13 }
 0x2b5   :  { %v820_v22 = vpack.c.bf16 %v2749_v16, %v2748_v12 }
 0x2b6   :  { %v769_v19 = vpop.f32.mrf.mxu0 }
 0x2b7   :  { %v819_v20 = vpack.c.bf16 %v769_v19, %v766_v15  ;;  %2793 = vmatpush3.bf16.msra.mxu1 %v2918_v13 }
 0x2b8   :  { %2794 = vmatprep.subr.bf16.mxu1 %v2919_v17 }
 0x2b9   :  { %2770 = vmatprep.mubr.msk.bf16.mxu1 %vm866_vm1, %v819_v20 }
 0x2ba   :  { %2771 = vmatmul.mubr.msk.bf16.gmra.mxu1 %vm866_vm1, %v820_v22 }
 0x2bb   :  { %2795 = vmatpush3.bf16.msra.mxu1 %v2919_v17  ;;  %2798 = vmatprep.mubr.msk.bf16.mxu1 %vm866_vm1, %v821_v21 }
 0x2bc   :  { %2796 = vmatprep.subr.bf16.mxu1 %v2920_v24 }
 0x2bf   :  { %2797 = vmatpush3.bf16.msra.mxu1 %v2920_v24 }
 0x2c2   :  { %2799 = vmatmul.mubr.msk.bf16.vlgmr.msra.gmra.mxu1 %vm866_vm1, %v822_v27  ;;  %v2922_v27 = vld [vmem:[%s3755_s8 + $0x8] sm:$0xff]  }
 0x2c3   :  { %2802 = vmatprep.mubr.msk.bf16.mxu1 %vm866_vm1, %v823_v26 }
 0x2ca   :  { %2803 = vmatmul.mubr.msk.bf16.gmra.mxu1 %vm866_vm1, %v824_v28  ;;  %v2923_v28 = vld [vmem:[%s3755_s8 + $0x10] sm:$0xff]  }
 0x362   :  { %v2784_v30 = vpop.f32.mrf.mxu0 }
 0x364   :  { %v1014_v33 = vpop.f32.mrf.mxu0 }
 0x366   :  { %v2785_v36 = vpop.f32.mrf.mxu0 }
 0x368   :  { %v1017_v39 = vpop.f32.mrf.mxu0 }
 0x36a   :  { %v2788_v42 = vpop.f32.mrf.mxu0 }
 0x36c   :  { %v1030_v45 = vpop.f32.mrf.mxu0 }
 0x36e   :  { %v2789_v49 = vpop.f32.mrf.mxu0 }
 0x370   :  { %v1033_v57 = vpop.f32.mrf.mxu0 }
 0x372   :  { %v2768_v31 = vpop.f32.mrf.mxu1 }
 0x373   :  { %v1023_v58 = vadd.f32 %v2784_v30, %v2768_v31  ;;  %v2925_v30 = vld [vmem:[%s3755_s8 + $0x20] sm:$0xff]   ;;  %v2926_v31 = vld [vmem:[%s3755_s8 + $0x28] sm:$0xff]  }
 0x374   :  { %v913_v32 = vpop.f32.mrf.mxu1 }
 0x375   :  { %v1015_v7 = vadd.f32 %v1014_v33, %v913_v32  ;;  %v2927_v32 = vld [vmem:[%s3755_s8 + $0x30] sm:$0xff]   ;;  %v2928_v33 = vld [vmem:[%s3755_s8 + $0x38] sm:$0xff]  }
 0x376   :  { %v2769_v34 = vpop.f32.mrf.mxu1 }
 0x377   :  { %v1026_v53 = vadd.f32 %v2785_v36, %v2769_v34  ;;  %v2929_v34 = vld [vmem:[%s3755_s8 + $0x40] sm:$0xff]   ;;  %v2931_v36 = vld [vmem:[%s3755_s8 + $0x50] sm:$0xff]  }
 0x378   :  { %v916_v35 = vpop.f32.mrf.mxu1 }
 0x379   :  { %v1018_v3 = vadd.f32 %v1017_v39, %v916_v35  ;;  %v2930_v35 = vld [vmem:[%s3755_s8 + $0x48] sm:$0xff]  }
 0x37a   :  { %v2772_v37 = vpop.f32.mrf.mxu1  ;;  %v2934_v39 = vld [vmem:[%s3755_s8 + $0x68] sm:$0xff]  }
 0x37b   :  { %v1039_v48 = vadd.f32 %v2788_v42, %v2772_v37  ;;  %v2932_v37 = vld [vmem:[%s3755_s8 + $0x58] sm:$0xff]   ;;  %v2937_v42 = vld [vmem:[%s3755_s8 + $0x80] sm:$0xff]  }
 0x37c   :  { %v929_v38 = vpop.f32.mrf.mxu1 }
 0x37d   :  { %v1031_v51 = vadd.f32 %v1030_v45, %v929_v38  ;;  %v2933_v38 = vld [vmem:[%s3755_s8 + $0x60] sm:$0xff]   ;;  %v2940_v45 = vld [vmem:[%s3755_s8 + $0x98] sm:$0xff]  }
 0x37e   :  { %v2773_v40 = vpop.f32.mrf.mxu1 }
 0x37f   :  { %v1042_v55 = vadd.f32 %v2789_v49, %v2773_v40  ;;  %v2935_v40 = vld [vmem:[%s3755_s8 + $0x70] sm:$0xff]  }
 0x380   :  { %v932_v41 = vpop.f32.mrf.mxu1  ;;  %v2945_v49 = vld [vmem:[%s3757_s9 + $0xb0] ss:$8 sps:$4 sm:$0xff]  }
 0x381   :  { %v1034_v62 = vadd.f32 %v1033_v57, %v932_v41  ;;  %v2936_v41 = vld [vmem:[%s3755_s8 + $0x78] sm:$0xff]  }
 0x382   :  { %v2800_v43 = vpop.f32.mrf.mxu1  ;;  %v2954_v57 = vld [vmem:[%s3757_s9 + $0x50] ss:$8 sps:$4 sm:$0xff]  }
 0x383   :  { %v1157_v1 = vadd.f32 %v2800_v43, %v1023_v58  ;;  %v2938_v43 = vld [vmem:[%s3755_s8 + $0x88] sm:$0xff]  }
 0x384   :  { %v1124_v44 = vpop.f32.mrf.mxu1  ;;  %v2957_v58 = vld [vmem:[%s3757_s9 + $0xa0] ss:$8 sps:$4 sm:$0xff]  }
 0x385   :  { %v1172_v13 = vadd.f32 %v2437_v59, %v1157_v1  ;;  %v1155_v14 = vadd.f32 %v1124_v44, %v1015_v7  ;;  %v2939_v44 = vld [vmem:[%s3755_s8 + $0x90] sm:$0xff]  }
 0x386   :  { %v2801_v46 = vpop.f32.mrf.mxu1  ;;  %v2971_v1 = vld [vmem:[%s3757_s9 + $0x94] ss:$8 sps:$4 sm:$0xff]  }
 0x387   :  { %v1158_v60 = vadd.f32 %v2801_v46, %v1026_v53  ;;  %v1180_v21 = vmax.f32 %v1172_v13, 0.0  ;;  %v1170_v22 = vadd.f32 %v2437_v59, %v1155_v14  ;;  %v2941_v46 = vld [vmem:[%s3755_s8 + $0xa0] sm:$0xff]   ;;  %v2948_v53 = vld [vmem:[%s3757_s9 + $0x70] ss:$8 sps:$4 sm:$0xff]  }
 0x388   :  { %v1127_v47 = vpop.f32.mrf.mxu1 }
 0x389   :  { %v1173_v8 = vadd.f32 %v2437_v59, %v1158_v60  ;;  %v1156_v9 = vadd.f32 %v1127_v47, %v1018_v3  ;;  %v1178_v25 = vmax.f32 %v1170_v22, 0.0  ;;  %v2942_v47 = vld [vmem:[%s3755_s8 + $0xa8] sm:$0xff]  }
 0x38a   :  { %v2804_v50 = vpop.f32.mrf.mxu1  ;;  %v2962_v60 = vld [vmem:[%s3757_s9 + $0x44] ss:$8 sps:$4 sm:$0xff]  }
 0x38b   :  { %v1161_v52 = vadd.f32 %v2804_v50, %v1039_v48  ;;  %v1181_v18 = vmax.f32 %v1173_v8, 0.0  ;;  %v1171_v19 = vadd.f32 %v2437_v59, %v1156_v9  ;;  %v2943_v48 = vld [vmem:[%s3755_s8 + $0xb0] sm:$0xff]   ;;  %v2977_v3 = vld [vmem:[%s3757_s9 + $0x84] ss:$8 sps:$4 sm:$0xff]  }
 0x38c   :  { %v1140_v54 = vpop.f32.mrf.mxu1  ;;  %v2947_v50 = vld [vmem:[%s3757_s9 + $0xb4] ss:$8 sps:$4 sm:$0xff]  }
 0x38d   :  { %v1159_v56 = vadd.f32 %v1140_v54, %v1031_v51  ;;  %v1176_v63 = vadd.f32 %v2437_v59, %v1161_v52  ;;  %v1179_v23 = vmax.f32 %v1171_v19, 0.0  ;;  %v1187_v24 = vpack.c.bf16 %v1181_v18, %v1180_v21  ;;  %v2944_v51 = vld [vmem:[%s3755_s8 + $0xb8] sm:$0xff]   ;;  %v2953_v54 = vld [vmem:[%s3757_s9 + $0x64] ss:$8 sps:$4 sm:$0xff]  }
 0x38e   :  { %v2805_v61 = vpop.f32.mrf.mxu1  ;;  %v2950_v52 = vld [vmem:[%s3757_s9 + $0x74] ss:$8 sps:$4 sm:$0xff]  }
 0x38f   :  { %v1162_v0 = vadd.f32 %v2805_v61, %v1042_v55  ;;  %v1174_v4 = vadd.f32 %v2437_v59, %v1159_v56  ;;  %v1184_v10 = vmax.f32 %v1176_v63, 0.0  ;;  %v1186_v26 = vpack.c.bf16 %v1179_v23, %v1178_v25  ;;  %1768 = vmatprep.subr.bf16.mxu1 %v2950_v52  ;;  %v2951_v55 = vld [vmem:[%s3757_s9 + $0x60] ss:$8 sps:$4 sm:$0xff]   ;;  %v2956_v56 = vld [vmem:[%s3757_s9 + $0x54] ss:$8 sps:$4 sm:$0xff]  }
 0x390   :  { %v1143_v2 = vpop.f32.mrf.mxu1  ;;  %1769 = vmatpush1.bf16.msra.mxu1 %v2948_v53  ;;  %v2960_v61 = vld [vmem:[%s3757_s9 + $0x40] ss:$8 sps:$4 sm:$0xff]   ;;  %v2965_v63 = vld [vmem:[%s3757_s9 + $0x34] ss:$8 sps:$4 sm:$0xff]  }
 0x391   :  { %v1177_v5 = vadd.f32 %v2437_v59, %v1162_v0  ;;  %v1160_v6 = vadd.f32 %v1143_v2, %v1034_v62  ;;  %v1182_v15 = vmax.f32 %v1174_v4, 0.0  ;;  %1770 = vmatprep.subr.bf16.mxu1 %v2953_v54  ;;  %v2981_v62 = vmov 0   ;;  %v2969_v0 = vld [vmem:[%s3757_s9 + $0x90] ss:$8 sps:$4 sm:$0xff]   ;;  %v2975_v2 = vld [vmem:[%s3757_s9 + $0x80] ss:$8 sps:$4 sm:$0xff]  }
 0x392   :  { %1792 = vmatprep.mubr.bf16.mxu1 %v2981_v62 }
 0x393   :  { %v1185_v11 = vmax.f32 %v1177_v5, 0.0  ;;  %v1175_v12 = vadd.f32 %v2437_v59, %v1160_v6  ;;  %v2959_v59 = vld [vmem:[%s3757_s9 + $0xa4] ss:$8 sps:$4 sm:$0xff]  }
 0x394   :  { %1771 = vmatpush1.bf16.msra.mxu1 %v2951_v55 }
 0x395   :  { %v1183_v16 = vmax.f32 %v1175_v12, 0.0  ;;  %v1189_v17 = vpack.c.bf16 %v1185_v11, %v1184_v10  ;;  %1772 = vmatprep.subr.bf16.mxu1 %v2956_v56 }
 0x397   :  { %2806 = vmatprep.subr.bf16.mxu0 %v1189_v17  ;;  %v1188_v20 = vpack.c.bf16 %v1183_v16, %v1182_v15 }
 0x398   :  { %2807 = vmatpush3.bf16.msra.mxu0 %v1189_v17  ;;  %1773 = vmatpush1.bf16.msra.mxu1 %v2954_v57 }
 0x399   :  { %2808 = vmatprep.subr.bf16.mxu0 %v1188_v20  ;;  %1774 = vmatprep.subr.bf16.mxu1 %v2962_v60 }
 0x39c   :  { %2809 = vmatpush3.bf16.msra.mxu0 %v1188_v20  ;;  %1775 = vmatpush1.bf16.msra.mxu1 %v2960_v61 }
 0x39d   :  { %2810 = vmatprep.subr.bf16.mxu0 %v1187_v24  ;;  %1945 = vmatprep.subr.bf16.mxu1 %v2965_v63 }
 0x3a0   :  { %2811 = vmatpush3.bf16.msra.mxu0 %v1187_v24 }
 0x3a1   :  { %2812 = vmatprep.subr.bf16.mxu0 %v1186_v26 }
 0x3a4   :  { %2813 = vmatpush3.bf16.msra.mxu0 %v1186_v26 }
 0x3a5   :  { %2131 = vmatprep.subr.bf16.mxu0 %v2947_v50 }
 0x3a7   :  { %2815 = vmatmul.mubr.msk.bf16.vlgmr.msra.gmra.mxu0 %vm866_vm1, %v2922_v27 }
 0x3a8   :  { %2818 = vmatprep.mubr.msk.bf16.mxu0 %vm866_vm1, %v2923_v28  ;;  %2132 = vmatpush1.bf16.msra.mxu0 %v2945_v49 }
 0x3a9   :  { %2133 = vmatprep.subr.bf16.mxu0 %v2959_v59 }
 0x3ac   :  { %2134 = vmatpush1.bf16.msra.mxu0 %v2957_v58 }
 0x3ad   :  { %2135 = vmatprep.subr.bf16.mxu0 %v2971_v1 }
 0x3af   :  { %2819 = vmatmul.mubr.msk.bf16.gmra.mxu0 %vm866_vm1, %v2924_v29 }
 0x3b0   :  { %2822 = vmatprep.mubr.msk.bf16.mxu0 %vm866_vm1, %v2925_v30  ;;  %2136 = vmatpush1.bf16.msra.mxu0 %v2969_v0 }
 0x3b1   :  { %2137 = vmatprep.subr.bf16.mxu0 %v2977_v3 }
 0x3b4   :  { %2138 = vmatpush1.bf16.msra.mxu0 %v2975_v2 }
 0x3b7   :  { %2823 = vmatmul.mubr.msk.bf16.gmra.mxu0 %vm866_vm1, %v2926_v31 }
 0x3b8   :  { %2826 = vmatprep.mubr.msk.bf16.mxu0 %vm866_vm1, %v2927_v32  ;;  %v2963_v32 = vld [vmem:[%s3757_s9 + $0x30] ss:$8 sps:$4 sm:$0xff]  }
 0x3bf   :  { %2827 = vmatmul.mubr.msk.bf16.gmra.mxu0 %vm866_vm1, %v2928_v33 }
 0x3c0   :  { %2830 = vmatprep.mubr.msk.bf16.mxu0 %vm866_vm1, %v2929_v34  ;;  %v2968_v34 = vld [vmem:[%s3757_s9 + $0x24] ss:$8 sps:$4 sm:$0xff]  }
 0x3c7   :  { %2831 = vmatmul.mubr.msk.bf16.gmra.mxu0 %vm866_vm1, %v2930_v35 }
 0x3c8   :  { %2834 = vmatprep.mubr.msk.bf16.mxu0 %vm866_vm1, %v2931_v36 }
 0x3cf   :  { %2835 = vmatmul.mubr.msk.bf16.gmra.mxu0 %vm866_vm1, %v2932_v37  ;;  %v2966_v37 = vld [vmem:[%s3757_s9 + $0x20] ss:$8 sps:$4 sm:$0xff]  }
 0x3d0   :  { %2838 = vmatprep.mubr.msk.bf16.mxu0 %vm866_vm1, %v2933_v38  ;;  %v2974_v38 = vld [vmem:[%s3757_s9 + $0x14] ss:$8 sps:$4 sm:$0xff]  }
 0x3d7   :  { %2839 = vmatmul.mubr.msk.bf16.gmra.mxu0 %vm866_vm1, %v2934_v39 }
 0x3d8   :  { %2842 = vmatprep.mubr.msk.bf16.mxu0 %vm866_vm1, %v2935_v40 }
 0x3df   :  { %2843 = vmatmul.mubr.msk.bf16.gmra.mxu0 %vm866_vm1, %v2936_v41  ;;  %v2972_v41 = vld [vmem:[%s3757_s9 + $0x10] ss:$8 sps:$4 sm:$0xff]  }
 0x3e0   :  { %2846 = vmatprep.mubr.msk.bf16.mxu0 %vm866_vm1, %v2937_v42 }
 0x3e7   :  { %2847 = vmatmul.mubr.msk.bf16.gmra.mxu0 %vm866_vm1, %v2938_v43  ;;  %v2980_v43 = vld [vmem:[%s3757_s9 + $0x4] ss:$8 sps:$4 sm:$0xff]  }
 0x3e8   :  { %2850 = vmatprep.mubr.msk.bf16.mxu0 %vm866_vm1, %v2939_v44 }
 0x3ef   :  { %2851 = vmatmul.mubr.msk.bf16.gmra.mxu0 %vm866_vm1, %v2940_v45 }
 0x3f0   :  { %2854 = vmatprep.mubr.msk.bf16.mxu0 %vm866_vm1, %v2941_v46  ;;  %v2978_v46 = vld [vmem:[%s3757_s9] ss:$8 sps:$4 sm:$0xff]  }
 0x3f7   :  { %2855 = vmatmul.mubr.msk.bf16.gmra.mxu0 %vm866_vm1, %v2942_v47 }
 0x3f8   :  { %2858 = vmatprep.mubr.msk.bf16.mxu0 %vm866_vm1, %v2943_v48 }
 0x3ff   :  { %2859 = vmatmul.mubr.msk.bf16.gmra.mxu0 %vm866_vm1, %v2944_v51 }
 0x400   :  { %2155 = vmatprep.mubr.bf16.mxu0 %v2981_v62 }
 0x467   :  { %v3408_v4 = vpop.f32.mrf.mxu0 }
 0x469   :  { %v3410_v5 = vpop.f32.mrf.mxu0 }
 0x46b   :  { %v3412_v6 = vpop.f32.mrf.mxu0 }
 0x46c   :  { %v1656_v7 = vpack.c.bf16 %v3412_v6, %v3408_v4 }
 0x46d   :  { %v3416_v8 = vpop.f32.mrf.mxu0 }
 0x46e   :  { %v1655_v9 = vpack.c.bf16 %v3416_v8, %v3410_v5 }
 0x46f   :  { %v3420_v10 = vpop.f32.mrf.mxu0 }
 0x471   :  { %v3422_v11 = vpop.f32.mrf.mxu0 }
 0x473   :  { %v3424_v12 = vpop.f32.mrf.mxu0 }
 0x474   :  { %v1658_v13 = vpack.c.bf16 %v3424_v12, %v3420_v10 }
 0x475   :  { %v3428_v14 = vpop.f32.mrf.mxu0 }
 0x476   :  { %v1657_v15 = vpack.c.bf16 %v3428_v14, %v3422_v11 }
 0x477   :  { %v3432_v16 = vpop.f32.mrf.mxu0 }
 0x479   :  { %v3434_v17 = vpop.f32.mrf.mxu0 }
 0x47b   :  { %v3436_v18 = vpop.f32.mrf.mxu0 }
 0x47c   :  { %v1660_v19 = vpack.c.bf16 %v3436_v18, %v3432_v16 }
 0x47d   :  { %v3440_v20 = vpop.f32.mrf.mxu0 }
 0x47e   :  { %v1659_v21 = vpack.c.bf16 %v3440_v20, %v3434_v17 }
 0x47f   :  { %v3444_v22 = vpop.f32.mrf.mxu0 }
 0x481   :  { %v3446_v23 = vpop.f32.mrf.mxu0 }
 0x483   :  { %v3448_v24 = vpop.f32.mrf.mxu0 }
 0x484   :  { %v1662_v25 = vpack.c.bf16 %v3448_v24, %v3444_v22 }
 0x485   :  { %v3452_v26 = vpop.f32.mrf.mxu0 }
 0x486   :  { %v1661_v27 = vpack.c.bf16 %v3452_v26, %v3446_v23 }
 0x487   :  { %v2832_v28 = vpop.f32.mrf.mxu0 }
 0x489   :  { %v1528_v29 = vpop.f32.mrf.mxu0 }
 0x48b   :  { %v2833_v30 = vpop.f32.mrf.mxu0 }
 0x48c   :  { %v1664_v42 = vpack.c.bf16 %v2833_v30, %v2832_v28 }
 0x48d   :  { %v1531_v31 = vpop.f32.mrf.mxu0 }
 0x48e   :  { %v1663_v33 = vpack.c.bf16 %v1531_v31, %v1528_v29 }
 0x48f   :  { %v2836_v35 = vpop.f32.mrf.mxu0 }
 0x490   :  { %2502 = vmatmul.mubr.msk.bf16.vlgmr.msra.gmra.mxu1 %vm866_vm1, %v1663_v33 }
 0x491   :  { %1946 = vmatpush1.bf16.msra.mxu1 %v2963_v32  ;;  %v1544_v36 = vpop.f32.mrf.mxu0  ;;  %1802 = vmatprep.mubr.bf16.mxu1 %v2981_v62 }
 0x492   :  { %1947 = vmatprep.subr.bf16.mxu1 %v2968_v34 }
 0x493   :  { %v2837_v39 = vpop.f32.mrf.mxu0 }
 0x494   :  { %v1666_v54 = vpack.c.bf16 %v2837_v39, %v2836_v35 }
 0x495   :  { %v1547_v40 = vpop.f32.mrf.mxu0  ;;  %1948 = vmatpush1.bf16.msra.mxu1 %v2966_v37 }
 0x496   :  { %1949 = vmatprep.subr.bf16.mxu1 %v2974_v38  ;;  %v1665_v49 = vpack.c.bf16 %v1547_v40, %v1544_v36 }
 0x497   :  { %v2840_v44 = vpop.f32.mrf.mxu0 }
 0x498   :  { %2503 = vmatmul.mubr.msk.bf16.gmra.mxu1 %vm866_vm1, %v1664_v42 }
 0x499   :  { %1812 = vmatprep.mubr.bf16.mxu1 %v2981_v62  ;;  %v1560_v45 = vpop.f32.mrf.mxu0  ;;  %1950 = vmatpush1.bf16.msra.mxu1 %v2972_v41 }
 0x49a   :  { %1951 = vmatprep.subr.bf16.mxu1 %v2980_v43 }
 0x49b   :  { %v2841_v47 = vpop.f32.mrf.mxu0 }
 0x49c   :  { %v1668_v2 = vpack.c.bf16 %v2841_v47, %v2840_v44 }
 0x49d   :  { %v1563_v48 = vpop.f32.mrf.mxu0  ;;  %1952 = vmatpush1.bf16.msra.mxu1 %v2978_v46 }
 0x49e   :  { %v1667_v59 = vpack.c.bf16 %v1563_v48, %v1560_v45 }
 0x49f   :  { %v2844_v50 = vpop.f32.mrf.mxu0 }
 0x4a0   :  { %2504 = vmatmul.mubr.msk.bf16.gmra.mxu1 %vm866_vm1, %v1665_v49 }
 0x4a1   :  { %1822 = vmatprep.mubr.bf16.mxu1 %v2981_v62  ;;  %v1576_v51 = vpop.f32.mrf.mxu0 }
 0x4a3   :  { %v2845_v52 = vpop.f32.mrf.mxu0 }
 0x4a4   :  { %v1670_v34 = vpack.c.bf16 %v2845_v52, %v2844_v50 }
 0x4a5   :  { %v1579_v53 = vpop.f32.mrf.mxu0 }
 0x4a6   :  { %v1669_v30 = vpack.c.bf16 %v1579_v53, %v1576_v51 }
 0x4a7   :  { %v2848_v55 = vpop.f32.mrf.mxu0 }
 0x4a8   :  { %2505 = vmatmul.mubr.msk.bf16.gmra.mxu1 %vm866_vm1, %v1666_v54 }
 0x4a9   :  { %1832 = vmatprep.mubr.bf16.mxu1 %v2981_v62  ;;  %v1592_v56 = vpop.f32.mrf.mxu0 }
 0x4ab   :  { %v2849_v57 = vpop.f32.mrf.mxu0 }
 0x4ac   :  { %v1672_v0 = vpack.c.bf16 %v2849_v57, %v2848_v55 }
 0x4ad   :  { %v1595_v58 = vpop.f32.mrf.mxu0 }
 0x4ae   :  { %v1671_v60 = vpack.c.bf16 %v1595_v58, %v1592_v56 }
 0x4af   :  { %v2852_v61 = vpop.f32.mrf.mxu0 }
 0x4b0   :  { %2506 = vmatmul.mubr.msk.bf16.gmra.mxu1 %vm866_vm1, %v1667_v59  ;;  %2542 = vmatmul.mubr.msk.bf16.vlgmr.msra.gmra.mxu0 %vm866_vm1, %v1671_v60 }
 0x4b1   :  { %1842 = vmatprep.mubr.bf16.mxu1 %v2981_v62  ;;  %2165 = vmatprep.mubr.bf16.mxu0 %v2981_v62  ;;  %v1608_v63 = vpop.f32.mrf.mxu0 }
 0x4b3   :  { %v2853_v1 = vpop.f32.mrf.mxu0 }
 0x4b4   :  { %v1674_v32 = vpack.c.bf16 %v2853_v1, %v2852_v61 }
 0x4b5   :  { %v1611_v3 = vpop.f32.mrf.mxu0 }
 0x4b6   :  { %v1673_v28 = vpack.c.bf16 %v1611_v3, %v1608_v63 }
 0x4b7   :  { %v2856_v29 = vpop.f32.mrf.mxu0 }
 0x4b8   :  { %2507 = vmatmul.mubr.msk.bf16.gmra.mxu1 %vm866_vm1, %v1668_v2  ;;  %2543 = vmatmul.mubr.msk.bf16.gmra.mxu0 %vm866_vm1, %v1672_v0 }
 0x4b9   :  { %1852 = vmatprep.mubr.bf16.mxu1 %v2981_v62  ;;  %2175 = vmatprep.mubr.bf16.mxu0 %v2981_v62  ;;  %v1624_v31 = vpop.f32.mrf.mxu0 }
 0x4bb   :  { %v2857_v33 = vpop.f32.mrf.mxu0 }
 0x4bc   :  { %v1676_v39 = vpack.c.bf16 %v2857_v33, %v2856_v29 }
 0x4bd   :  { %v1627_v35 = vpop.f32.mrf.mxu0 }
 0x4be   :  { %v1675_v36 = vpack.c.bf16 %v1627_v35, %v1624_v31 }
 0x4bf   :  { %v2860_v37 = vpop.f32.mrf.mxu0 }
 0x4c0   :  { %2508 = vmatmul.mubr.msk.bf16.gmra.mxu1 %vm866_vm1, %v1669_v30  ;;  %2544 = vmatmul.mubr.msk.bf16.gmra.mxu0 %vm866_vm1, %v1673_v28 }
 0x4c1   :  { %1862 = vmatprep.mubr.bf16.mxu1 %v2981_v62  ;;  %2185 = vmatprep.mubr.bf16.mxu0 %v2981_v62  ;;  %v1640_v38 = vpop.f32.mrf.mxu0 }
 0x4c3   :  { %v2861_v40 = vpop.f32.mrf.mxu0 }
 0x4c4   :  { %v1678_v4 = vpack.c.bf16 %v2861_v40, %v2860_v37 }
 0x4c5   :  { %v1643_v5 = vpop.f32.mrf.mxu0 }
 0x4c6   :  { %v1677_v8 = vpack.c.bf16 %v1643_v5, %v1640_v38 }
 0x4c8   :  { %2509 = vmatmul.mubr.msk.bf16.gmra.mxu1 %vm866_vm1, %v1670_v34  ;;  %2545 = vmatmul.mubr.msk.bf16.gmra.mxu0 %vm866_vm1, %v1674_v32 }
 0x4c9   :  { %1969 = vmatprep.mubr.bf16.mxu1 %v2981_v62  ;;  %2195 = vmatprep.mubr.bf16.mxu0 %v2981_v62 }
 0x4d0   :  { %2518 = vmatmul.mubr.msk.bf16.vlgmr.msra.gmra.mxu1 %vm866_vm1, %v1655_v9  ;;  %2546 = vmatmul.mubr.msk.bf16.gmra.mxu0 %vm866_vm1, %v1675_v36 }
 0x4d1   :  { %1979 = vmatprep.mubr.bf16.mxu1 %v2981_v62  ;;  %2205 = vmatprep.mubr.bf16.mxu0 %v2981_v62 }
 0x4d8   :  { %2519 = vmatmul.mubr.msk.bf16.gmra.mxu1 %vm866_vm1, %v1656_v7  ;;  %2547 = vmatmul.mubr.msk.bf16.gmra.mxu0 %vm866_vm1, %v1676_v39 }
 0x4d9   :  { %1989 = vmatprep.mubr.bf16.mxu1 %v2981_v62  ;;  %2215 = vmatprep.mubr.bf16.mxu0 %v2981_v62 }
 0x4e0   :  { %2520 = vmatmul.mubr.msk.bf16.gmra.mxu1 %vm866_vm1, %v1657_v15  ;;  %2548 = vmatmul.mubr.msk.bf16.gmra.mxu0 %vm866_vm1, %v1677_v8 }
 0x4e1   :  { %1999 = vmatprep.mubr.bf16.mxu1 %v2981_v62  ;;  %2225 = vmatprep.mubr.bf16.mxu0 %v2981_v62 }
 0x4e8   :  { %2521 = vmatmul.mubr.msk.bf16.gmra.mxu1 %vm866_vm1, %v1658_v13  ;;  %2549 = vmatmul.mubr.msk.bf16.gmra.mxu0 %vm866_vm1, %v1678_v4 }
 0x4e9   :  { %2009 = vmatprep.mubr.bf16.mxu1 %v2981_v62 }
 0x4f0   :  { %2522 = vmatmul.mubr.msk.bf16.gmra.mxu1 %vm866_vm1, %v1659_v21 }
 0x4f1   :  { %2019 = vmatprep.mubr.bf16.mxu1 %v2981_v62 }
 0x4f8   :  { %2523 = vmatmul.mubr.msk.bf16.gmra.mxu1 %vm866_vm1, %v1660_v19 }
 0x4f9   :  { %2029 = vmatprep.mubr.bf16.mxu1 %v2981_v62 }
 0x500   :  { %2524 = vmatmul.mubr.msk.bf16.gmra.mxu1 %vm866_vm1, %v1661_v27 }
 0x501   :  { %2039 = vmatprep.mubr.bf16.mxu1 %v2981_v62 }
 0x508   :  { %2525 = vmatmul.mubr.msk.bf16.gmra.mxu1 %vm866_vm1, %v1662_v25 }
 0x550   :  { %v1794_v6 = vpop.f32.mrf.mxu1 }
 0x552   :  { %v1796_v7 = vpop.f32.mrf.mxu1 }
 0x554   :  { %v1798_v9 = vpop.f32.mrf.mxu1 }
 0x556   :  { %v1800_v10 = vpop.f32.mrf.mxu1 }
 0x558   :  { %v3547_v11 = vpop.f32.mrf.mxu1 }
 0x55a   :  { %v3549_v12 = vpop.f32.mrf.mxu1 }
 0x55c   :  { %v3551_v13 = vpop.f32.mrf.mxu1 }
 0x55e   :  { %v3553_v14 = vpop.f32.mrf.mxu1 }
 0x560   :  { %v3555_v15 = vpop.f32.mrf.mxu1 }
 0x562   :  { %v3557_v62 = vpop.f32.mrf.mxu1 }
 0x564   :  { %v3559_v16 = vpop.f32.mrf.mxu1 }
 0x566   :  { %v3561_v17 = vpop.f32.mrf.mxu1 }
 0x568   :  { %v3563_v18 = vpop.f32.mrf.mxu1 }
 0x56a   :  { %v3565_v19 = vpop.f32.mrf.mxu1 }
 0x56c   :  { %v3567_v20 = vpop.f32.mrf.mxu1 }
 0x56e   :  { %v3569_v21 = vpop.f32.mrf.mxu1 }
 0x570   :  { %v3571_v22 = vpop.f32.mrf.mxu1  ;;  %v2157_v23 = vpop.f32.mrf.mxu0 }
 0x572   :  { %v3573_v24 = vpop.f32.mrf.mxu1  ;;  %v2159_v25 = vpop.f32.mrf.mxu0 }
 0x574   :  { %v3575_v26 = vpop.f32.mrf.mxu1  ;;  %v2161_v27 = vpop.f32.mrf.mxu0 }
 0x576   :  { %v3577_v41 = vpop.f32.mrf.mxu1  ;;  %v2163_v42 = vpop.f32.mrf.mxu0 }
 0x578   :  { %v3579_v43 = vpop.f32.mrf.mxu1  ;;  %v2167_v44 = vpop.f32.mrf.mxu0 }
 0x57a   :  { %v3581_v45 = vpop.f32.mrf.mxu1  ;;  %v2169_v46 = vpop.f32.mrf.mxu0 }
 0x57c   :  { %v3583_v47 = vpop.f32.mrf.mxu1  ;;  %v2171_v48 = vpop.f32.mrf.mxu0 }
 0x57e   :  { %v3585_v49 = vpop.f32.mrf.mxu1  ;;  %v2173_v50 = vpop.f32.mrf.mxu0 }
 0x580   :  { %v3587_v51 = vpop.f32.mrf.mxu1  ;;  %v2177_v52 = vpop.f32.mrf.mxu0 }
 0x582   :  { %v3589_v53 = vpop.f32.mrf.mxu1  ;;  %v2179_v54 = vpop.f32.mrf.mxu0 }
 0x584   :  { %v3591_v55 = vpop.f32.mrf.mxu1  ;;  %v2181_v56 = vpop.f32.mrf.mxu0 }
 0x586   :  { %v3593_v57 = vpop.f32.mrf.mxu1  ;;  %v3595_v58 = vpop.f32.mrf.mxu0 }
 0x588   :  { %v3597_v59 = vpop.f32.mrf.mxu1  ;;  %v3599_v60 = vpop.f32.mrf.mxu0 }
 0x58a   :  { %v3601_v61 = vpop.f32.mrf.mxu1  ;;  %v3603_v63 = vpop.f32.mrf.mxu0 }
 0x58c   :  { %v3605_v0 = vpop.f32.mrf.mxu1  ;;  %v3607_v1 = vpop.f32.mrf.mxu0 }
 0x58e   :  { %v3609_v2 = vpop.f32.mrf.mxu1  ;;  %v3611_v28 = vpop.f32.mrf.mxu0 }
 0x590   :  { %v1971_v3 = vpop.f32.mrf.mxu1  ;;  %v3613_v34 = vpop.f32.mrf.mxu0 }
 0x591   :  { %v1972_v29 = vadd.f32 %v1971_v3, %v1794_v6 }
 0x592   :  { %v1973_v30 = vpop.f32.mrf.mxu1  ;;  %v3621_v5 = vpop.f32.mrf.mxu0 }
 0x593   :  { %v2236_v31 = vadd.f32 %v2157_v23, %v1972_v29  ;;  %v1974_v32 = vadd.f32 %v1973_v30, %v1796_v7 }
 0x594   :  { %v1975_v33 = vpop.f32.mrf.mxu1 }
 0x595   :  { %2268 = vst [vmem:[%s3758_s10] sm:$0xff] %v2236_v31  ;;  %v2237_v35 = vadd.f32 %v2159_v25, %v1974_v32  ;;  %v1976_v36 = vadd.f32 %v1975_v33, %v1798_v9 }
 0x596   :  { %v1977_v37 = vpop.f32.mrf.mxu1 }
 0x597   :  { %2269 = vst [vmem:[%s3758_s10 + $0x8] sm:$0xff] %v2237_v35  ;;  %v2238_v38 = vadd.f32 %v2161_v27, %v1976_v36  ;;  %v1978_v39 = vadd.f32 %v1977_v37, %v1800_v10  ;;  %v2201_v10 = vpop.f32.mrf.mxu0 }
 0x598   :  { %v1981_v40 = vpop.f32.mrf.mxu1 }
 0x599   :  { %2270 = vst [vmem:[%s3758_s10 + $0x10] sm:$0xff] %v2238_v38  ;;  %v2239_v8 = vadd.f32 %v2163_v42, %v1978_v39  ;;  %v1982_v4 = vadd.f32 %v1981_v40, %v3547_v11  ;;  %v2203_v29 = vpop.f32.mrf.mxu0 }
 0x59a   :  { %v1983_v6 = vpop.f32.mrf.mxu1 }
 0x59b   :  { %2271 = vst [vmem:[%s3758_s10 + $0x18] sm:$0xff] %v2239_v8  ;;  %v2240_v7 = vadd.f32 %v2167_v44, %v1982_v4  ;;  %v1984_v9 = vadd.f32 %v1983_v6, %v3549_v12  ;;  %v2207_v32 = vpop.f32.mrf.mxu0 }
 0x59c   :  { %v1985_v23 = vpop.f32.mrf.mxu1 }
 0x59d   :  { %2272 = vst [vmem:[%s3758_s10 + $0x20] sm:$0xff] %v2240_v7  ;;  %v2241_v25 = vadd.f32 %v2169_v46, %v1984_v9  ;;  %v1986_v27 = vadd.f32 %v1985_v23, %v3551_v13  ;;  %v2209_v36 = vpop.f32.mrf.mxu0 }
 0x59e   :  { %v1987_v42 = vpop.f32.mrf.mxu1 }
 0x59f   :  { %2273 = vst [vmem:[%s3758_s10 + $0x28] sm:$0xff] %v2241_v25  ;;  %v2242_v11 = vadd.f32 %v2171_v48, %v1986_v27  ;;  %v1988_v3 = vadd.f32 %v1987_v42, %v3553_v14 }
 0x5a0   :  { %v1991_v44 = vpop.f32.mrf.mxu1 }
 0x5a1   :  { %2274 = vst [vmem:[%s3758_s10 + $0x30] sm:$0xff] %v2242_v11  ;;  %v2243_v12 = vadd.f32 %v2173_v50, %v1988_v3  ;;  %v1992_v30 = vadd.f32 %v1991_v44, %v3555_v15 }
 0x5a2   :  { %v1993_v46 = vpop.f32.mrf.mxu1 }
 0x5a3   :  { %2275 = vst [vmem:[%s3758_s10 + $0x38] sm:$0xff] %v2243_v12  ;;  %v2244_v13 = vadd.f32 %v2177_v52, %v1992_v30  ;;  %v1994_v31 = vadd.f32 %v1993_v46, %v3557_v62 }
 0x5a4   :  { %v1995_v48 = vpop.f32.mrf.mxu1 }
 0x5a5   :  { %2276 = vst [vmem:[%s3758_s10 + $0x40] sm:$0xff] %v2244_v13  ;;  %v2245_v14 = vadd.f32 %v2179_v54, %v1994_v31  ;;  %v1996_v33 = vadd.f32 %v1995_v48, %v3559_v16 }
 0x5a6   :  { %v1997_v50 = vpop.f32.mrf.mxu1 }
 0x5a7   :  { %2277 = vst [vmem:[%s3758_s10 + $0x48] sm:$0xff] %v2245_v14  ;;  %v2246_v15 = vadd.f32 %v2181_v56, %v1996_v33  ;;  %v1998_v35 = vadd.f32 %v1997_v50, %v3561_v17  ;;  %v2211_v17 = vpop.f32.mrf.mxu0 }
 0x5a8   :  { %v2001_v52 = vpop.f32.mrf.mxu1 }
 0x5a9   :  { %2278 = vst [vmem:[%s3758_s10 + $0x50] sm:$0xff] %v2246_v15  ;;  %v2247_v62 = vadd.f32 %v3595_v58, %v1998_v35  ;;  %v2002_v54 = vadd.f32 %v2001_v52, %v3563_v18 }
 0x5aa   :  { %v2003_v37 = vpop.f32.mrf.mxu1 }
 0x5ab   :  { %2279 = vst [vmem:[%s3758_s10 + $0x58] sm:$0xff] %v2247_v62  ;;  %v2248_v16 = vadd.f32 %v3599_v60, %v2002_v54  ;;  %v2004_v56 = vadd.f32 %v2003_v37, %v3565_v19  ;;  %v2213_v19 = vpop.f32.mrf.mxu0 }
 0x5ac   :  { %v2005_v38 = vpop.f32.mrf.mxu1 }
 0x5ad   :  { %2280 = vst [vmem:[%s3758_s10 + $0x60] sm:$0xff] %v2248_v16  ;;  %v2249_v39 = vadd.f32 %v3603_v63, %v2004_v56  ;;  %v2006_v58 = vadd.f32 %v2005_v38, %v3567_v20 }
 0x5ae   :  { %v2007_v18 = vpop.f32.mrf.mxu1 }
 0x5af   :  { %2281 = vst [vmem:[%s3758_s10 + $0x68] sm:$0xff] %v2249_v39  ;;  %v2250_v40 = vadd.f32 %v3607_v1, %v2006_v58  ;;  %v2008_v60 = vadd.f32 %v2007_v18, %v3569_v21  ;;  %v2217_v21 = vpop.f32.mrf.mxu0 }
 0x5b0   :  { %v2011_v8 = vpop.f32.mrf.mxu1 }
 0x5b1   :  { %2282 = vst [vmem:[%s3758_s10 + $0x70] sm:$0xff] %v2250_v40  ;;  %v2251_v4 = vadd.f32 %v3611_v28, %v2008_v60  ;;  %v2012_v63 = vadd.f32 %v2011_v8, %v3571_v22  ;;  %v2219_v25 = vpop.f32.mrf.mxu0 }
 0x5b2   :  { %v2013_v20 = vpop.f32.mrf.mxu1 }
 0x5b3   :  { %2283 = vst [vmem:[%s3758_s10 + $0x78] sm:$0xff] %v2251_v4  ;;  %v2252_v6 = vadd.f32 %v3613_v34, %v2012_v63  ;;  %v2014_v1 = vadd.f32 %v2013_v20, %v3573_v24 }
 0x5b4   :  { %v2015_v7 = vpop.f32.mrf.mxu1 }
 0x5b5   :  { %2284 = vst [vmem:[%s3758_s10 + $0x80] sm:$0xff] %v2252_v6  ;;  %v2253_v9 = vadd.f32 %v3621_v5, %v2014_v1  ;;  %v2016_v28 = vadd.f32 %v2015_v7, %v3575_v26 }
 0x5b6   :  { %v2017_v22 = vpop.f32.mrf.mxu1 }
 0x5b7   :  { %2285 = vst [vmem:[%s3758_s10 + $0x88] sm:$0xff] %v2253_v9  ;;  %v2254_v23 = vadd.f32 %v2201_v10, %v2016_v28  ;;  %v2018_v34 = vadd.f32 %v2017_v22, %v3577_v41  ;;  %v2221_v10 = vpop.f32.mrf.mxu0 }
 0x5b8   :  { %v2021_v24 = vpop.f32.mrf.mxu1 }
 0x5b9   :  { %2286 = vst [vmem:[%s3758_s10 + $0x90] sm:$0xff] %v2254_v23  ;;  %v2255_v27 = vadd.f32 %v2203_v29, %v2018_v34  ;;  %v2022_v42 = vadd.f32 %v2021_v24, %v3579_v43  ;;  %v2223_v30 = vpop.f32.mrf.mxu0 }
 0x5ba   :  { %v2023_v5 = vpop.f32.mrf.mxu1 }
 0x5bb   :  { %2287 = vst [vmem:[%s3758_s10 + $0x98] sm:$0xff] %v2255_v27  ;;  %v2256_v26 = vadd.f32 %v2207_v32, %v2022_v42  ;;  %v2024_v11 = vadd.f32 %v2023_v5, %v3581_v45  ;;  %v2227_v32 = vpop.f32.mrf.mxu0 }
 0x5bc   :  { %v2025_v3 = vpop.f32.mrf.mxu1 }
 0x5bd   :  { %2288 = vst [vmem:[%s3758_s10 + $0xa0] sm:$0xff] %v2256_v26  ;;  %v2257_v41 = vadd.f32 %v2209_v36, %v2024_v11  ;;  %v2026_v44 = vadd.f32 %v2025_v3, %v3583_v47  ;;  %v2229_v35 = vpop.f32.mrf.mxu0 }
 0x5be   :  { %v2027_v29 = vpop.f32.mrf.mxu1 }
 0x5bf   :  { %2289 = vst [vmem:[%s3758_s10 + $0xa8] sm:$0xff] %v2257_v41  ;;  %v2258_v43 = vadd.f32 %v2211_v17, %v2026_v44  ;;  %v2028_v12 = vadd.f32 %v2027_v29, %v3585_v49  ;;  %v2231_v37 = vpop.f32.mrf.mxu0 }
 0x5c0   :  { %v2031_v46 = vpop.f32.mrf.mxu1 }
 0x5c1   :  { %2290 = vst [vmem:[%s3758_s10 + $0xb0] sm:$0xff] %v2258_v43  ;;  %v2259_v45 = vadd.f32 %v2213_v19, %v2028_v12  ;;  %v2032_v13 = vadd.f32 %v2031_v46, %v3587_v51  ;;  %v2233_v39 = vpop.f32.mrf.mxu0 }
 0x5c2   :  { %v2033_v31 = vpop.f32.mrf.mxu1 }
 0x5c3   :  { %2291 = vst [vmem:[%s3758_s10 + $0xb8] sm:$0xff] %v2259_v45  ;;  %v2260_v47 = vadd.f32 %v2217_v21, %v2032_v13  ;;  %v2034_v48 = vadd.f32 %v2033_v31, %v3589_v53 }
 0x5c4   :  { %v2035_v14 = vpop.f32.mrf.mxu1 }
 0x5c5   :  { %2292 = vst [vmem:[%s3758_s10 + $0xc0] sm:$0xff] %v2260_v47  ;;  %v2261_v49 = vadd.f32 %v2219_v25, %v2034_v48  ;;  %v2036_v33 = vadd.f32 %v2035_v14, %v3591_v55 }
 0x5c6   :  { %v2037_v50 = vpop.f32.mrf.mxu1 }
 0x5c7   :  { %2293 = vst [vmem:[%s3758_s10 + $0xc8] sm:$0xff] %v2261_v49  ;;  %v2262_v51 = vadd.f32 %v2221_v10, %v2036_v33  ;;  %v2038_v15 = vadd.f32 %v2037_v50, %v3593_v57 }
 0x5c8   :  { %v2041_v52 = vpop.f32.mrf.mxu1 }
 0x5c9   :  { %2294 = vst [vmem:[%s3758_s10 + $0xd0] sm:$0xff] %v2262_v51  ;;  %v2263_v53 = vadd.f32 %v2223_v30, %v2038_v15  ;;  %v2042_v36 = vadd.f32 %v2041_v52, %v3597_v59 }
 0x5ca   :  { %v2043_v62 = vpop.f32.mrf.mxu1 }
 0x5cb   :  { %2295 = vst [vmem:[%s3758_s10 + $0xd8] sm:$0xff] %v2263_v53  ;;  %v2264_v55 = vadd.f32 %v2227_v32, %v2042_v36  ;;  %v2044_v54 = vadd.f32 %v2043_v62, %v3601_v61 }
 0x5cc   :  { %v2045_v16 = vpop.f32.mrf.mxu1 }
 0x5cd   :  { %2296 = vst [vmem:[%s3758_s10 + $0xe0] sm:$0xff] %v2264_v55  ;;  %v2265_v57 = vadd.f32 %v2229_v35, %v2044_v54  ;;  %v2046_v56 = vadd.f32 %v2045_v16, %v3605_v0 }
 0x5ce   :  { %v2047_v17 = vpop.f32.mrf.mxu1 }
 0x5cf   :  { %2297 = vst [vmem:[%s3758_s10 + $0xe8] sm:$0xff] %v2265_v57  ;;  %v2266_v59 = vadd.f32 %v2231_v37, %v2046_v56  ;;  %v2048_v38 = vadd.f32 %v2047_v17, %v3609_v2 }
 0x5d1   :  { %2298 = vst [vmem:[%s3758_s10 + $0xf0] sm:$0xff] %v2266_v59  ;;  %v2267_v61 = vadd.f32 %v2233_v39, %v2048_v38 }
 0x5d3   :  { %2299 = vst [vmem:[%s3758_s10 + $0xf8] sm:$0xff] %v2267_v61 }

</bundles_post_ra>
